<compile_context>
chip_gen: v7x
topology: tpu7x:2x2x1
jax: 0.10.0
libtpu: 0.0.40
codegen_flags: <defaults>
</compile_context>

<pallas_src>
import functools

import jax
import jax.numpy as jnp
from jax.experimental import pallas as pl
from jax.experimental.pallas import tpu as pltpu


def _gaussian_basis_kernel(x_ref, w_ref, o_ref, *, coeff):
    # x_ref: (TN, 1)   distances tile (lane-sparse but tiny; cost hidden
    #                  under the output-store bandwidth — do not re-layout)
    # w_ref: (1, B)    gaussian centers (resident every grid step)
    # o_ref: (TN, B)   output tile
    d = x_ref[...] - w_ref[...]                  # broadcast (TN,1)-(1,B) -> (TN,B)
    o_ref[...] = jnp.exp(coeff * d * d).astype(o_ref.dtype)


def gaussian_basis(x, r_max: float, num_basis: int = 128, *,
                   tile_n: int = 1024, out_dtype=jnp.float32):
    """x: [N, 1] float32 edge distances. Returns [N, num_basis] in out_dtype."""
    n = x.shape[0]
    assert x.ndim == 2 and x.shape[1] == 1, "x must be [N, 1]"

    # Deterministic parameter init, exactly as in the module __init__.
    gaussian_weights = jnp.linspace(0.0, r_max, num_basis, dtype=jnp.float32)
    gaussian_weights = gaussian_weights.reshape(1, num_basis)
    coeff = -0.5 / (r_max / (num_basis - 1)) ** 2

    # Pad rows so arbitrary N keeps the large tile (perf), then slice back.
    num_tiles = pl.cdiv(n, tile_n)
    n_pad = num_tiles * tile_n
    if n_pad != n:
        x = jnp.pad(x, ((0, n_pad - n), (0, 0)))

    kernel = functools.partial(_gaussian_basis_kernel, coeff=coeff)

    itemsize = jnp.dtype(out_dtype).itemsize
    cost = pl.CostEstimate(
        flops=3 * n_pad * num_basis,
        transcendentals=n_pad * num_basis,
        bytes_accessed=itemsize * n_pad * num_basis + 4 * n_pad + 4 * num_basis,
    )

    out = pl.pallas_call(
        kernel,
        out_shape=jax.ShapeDtypeStruct((n_pad, num_basis), out_dtype),
        grid_spec=pltpu.PrefetchScalarGridSpec(
            num_scalar_prefetch=0,
            grid=(num_tiles,),
            in_specs=[
                pl.BlockSpec((tile_n, 1), lambda i: (i, 0)),          # x tile
                pl.BlockSpec((1, num_basis), lambda i: (0, 0)),       # centers (resident)
            ],
            out_specs=pl.BlockSpec((tile_n, num_basis), lambda i: (i, 0)),
        ),
        compiler_params=pltpu.CompilerParams(
            dimension_semantics=("parallel",)),
        cost_estimate=cost,
    )(x, gaussian_weights)

    return out[:n] if n_pad != n else out


if __name__ == "__main__":
    r_max = 5.0
    num_basis = 128
    n_edges = 200  # deliberately NOT a multiple of the tile -> exercises padding path

    key = jax.random.PRNGKey(0)
    # Edge distances in [0, r_max), shape [N, 1] like MACE's radial input.
    x = jax.random.uniform(key, (n_edges, 1), dtype=jnp.float32) * r_max

    out = gaussian_basis(x, r_max, num_basis)
    out = jax.block_until_ready(out)

    # Reference check in plain JAX.
    w = jnp.linspace(0.0, r_max, num_basis, dtype=jnp.float32)
    coeff = -0.5 / (r_max / (num_basis - 1)) ** 2
    ref = jnp.exp(coeff * (x - w[None, :]) ** 2)
    assert out.shape == (n_edges, num_basis)
    assert jnp.allclose(out, ref, atol=1e-6, rtol=1e-6)

    print("KERNEL_OK")
</pallas_src>

<mosaic_0001>
module attributes {stable_mosaic.version = 11 : i64} {
  func.func @_gaussian_basis_kernel(%arg0: i32, %arg1: memref<1024x1xf32, #tpu.memory_space<vmem>>, %arg2: memref<1x128xf32, #tpu.memory_space<vmem>>, %arg3: memref<1024x128xf32, #tpu.memory_space<vmem>>) attributes {dimension_semantics = [#tpu.dimension_semantics<parallel>], iteration_bounds = array<i64: 1>, scalar_prefetch = 0 : i64, scratch_operands = 0 : i64, tpu.core_type = #tpu.core_type<tc>, window_params = [{transform_indices = @transform_0, window_bounds = array<i64: 1024, 1>}, {pipeline_mode = #tpu.pipeline_mode<synchronous>, transform_indices = @transform_1, window_bounds = array<i64: 1, 128>}, {transform_indices = @transform_2, window_bounds = array<i64: 1024, 128>}]} {
    %c0 = arith.constant 0 : index
    %c0_0 = arith.constant 0 : index
    %0 = vector.load %arg1[%c0, %c0_0] : memref<1024x1xf32, #tpu.memory_space<vmem>>, vector<1024x1xf32>
    %c0_1 = arith.constant 0 : index
    %c0_2 = arith.constant 0 : index
    %1 = vector.load %arg2[%c0_1, %c0_2] : memref<1x128xf32, #tpu.memory_space<vmem>>, vector<1x128xf32>
    %2 = vector.broadcast %0 : vector<1024x1xf32> to vector<1024x128xf32>
    %3 = vector.broadcast %1 : vector<1x128xf32> to vector<1024x128xf32>
    %4 = arith.subf %2, %3 : vector<1024x128xf32>
    %cst = arith.constant -3.225800e+02 : f32
    %5 = vector.broadcast %cst : f32 to vector<1024x128xf32>
    %6 = arith.mulf %5, %4 : vector<1024x128xf32>
    %7 = arith.mulf %6, %4 : vector<1024x128xf32>
    %8 = math.exp %7 : vector<1024x128xf32>
    %c0_3 = arith.constant 0 : index
    %c0_4 = arith.constant 0 : index
    %9 = vector.load %arg3[%c0_3, %c0_4] : memref<1024x128xf32, #tpu.memory_space<vmem>>, vector<1024x128xf32>
    tpu.vector_store %arg3[%c0_3, %c0_4], %8 {strides = array<i32>} : memref<1024x128xf32, #tpu.memory_space<vmem>>, vector<1024x128xf32>,
    return
  }
  func.func @transform_0(%arg0: i32) -> (i32, i32) {
    %c0_i32 = arith.constant 0 : i32
    %c0_i32_0 = arith.constant 0 : i32
    return %arg0, %c0_i32 : i32, i32
  }
  func.func @transform_1(%arg0: i32) -> (i32, i32) {
    %c0_i32 = arith.constant 0 : i32
    %c0_i32_0 = arith.constant 0 : i32
    %c0_i32_1 = arith.constant 0 : i32
    return %c0_i32, %c0_i32_0 : i32, i32
  }
  func.func @transform_2(%arg0: i32) -> (i32, i32) {
    %c0_i32 = arith.constant 0 : i32
    %c0_i32_0 = arith.constant 0 : i32
    return %arg0, %c0_i32 : i32, i32
  }
}

</mosaic_0001>

<bundles_post_ra>
// kernel: tpu_custom_call.1
= control target key start
LH: loop header
LB: loop body
LE: loop exit
PB: predicated region body
PF: predicated region fallthrough
CT: control target
= control target key end

     0   :  { %v1860_v2 = vmov 0   ;;  %s2418_s0 = inlined_call_operand.vmem [shape: f32[1024,1], index: 0, kind: input, shape index: {}]   ;;  %s2419_s1 = inlined_call_operand.vmem [shape: f32[1,128], index: 1, kind: input, shape index: {}]   ;;  %s2420_s2 = inlined_call_operand.hbm [shape: f32[1024,128], index: 2, kind: output, shape index: {}]  }
   0x1   :  { %v14_v0 = vld [vmem:[%s2418_s0 + $0x10] sm:$0xff]  ;;  %v12_v1 = vld [vmem:[%s2418_s0] sm:$0xff]  ;;  %1577 = vset.pattern.permute.xlu1 %v1860_v2  ;;  %1576 = vset.pattern.permute.xlu0 %v1860_v2  ;;  %v15_v3 = vld [vmem:[%s2418_s0 + $0x18] sm:$0xff] }
   0x2   :  { %153 = vperm.xlu1 %1577, %v14_v0   ;;  %143 = vperm.xlu0 %1576, %v12_v1   ;;  %v13_v4 = vld [vmem:[%s2418_s0 + $0x8] sm:$0xff]  ;;  %v16_v6 = vld [vmem:[%s2418_s0 + $0x20] sm:$0xff]  ;;  %v19_v7 = vld [vmem:[%s2418_s0 + $0x38] sm:$0xff] }
   0x3   :  { %v17_v5 = vld [vmem:[%s2418_s0 + $0x28] sm:$0xff]  ;;  %v18_v8 = vld [vmem:[%s2418_s0 + $0x30] sm:$0xff]  ;;  %v20_v10 = vld [vmem:[%s2418_s0 + $0x40] sm:$0xff] }
   0x4   :  { %v21_v9 = vld [vmem:[%s2418_s0 + $0x48] sm:$0xff]  ;;  %v23_v11 = vld [vmem:[%s2418_s0 + $0x58] sm:$0xff]  ;;  %v22_v12 = vld [vmem:[%s2418_s0 + $0x50] sm:$0xff] }
   0x5   :  { %v25_v13 = vld [vmem:[%s2418_s0 + $0x68] sm:$0xff]  ;;  %v24_v14 = vld [vmem:[%s2418_s0 + $0x60] sm:$0xff] }
   0x6   :  { %158 = vperm.xlu1 %1577, %v15_v3   ;;  %148 = vperm.xlu0 %1576, %v13_v4  }
   0xa   :  { %168 = vperm.xlu1 %1577, %v17_v5   ;;  %163 = vperm.xlu0 %1576, %v16_v6  }
   0xe   :  { %178 = vperm.xlu1 %1577, %v19_v7   ;;  %173 = vperm.xlu0 %1576, %v18_v8  }
  0x12   :  { %188 = vperm.xlu1 %1577, %v21_v9   ;;  %183 = vperm.xlu0 %1576, %v20_v10  }
  0x16   :  { %198 = vperm.xlu1 %1577, %v23_v11   ;;  %193 = vperm.xlu0 %1576, %v22_v12  }
  0x17   :  { %7 = vsyncpa [#allocation3], 0  ;;  %v27_v15 = vld [vmem:[%s2418_s0 + $0x78] sm:$0xff]  ;;  %v26_v16 = vld [vmem:[%s2418_s0 + $0x70] sm:$0xff] }
  0x18   :  { %v29_v17 = vld [vmem:[%s2418_s0 + $0x88] sm:$0xff]  ;;  %v28_v18 = vld [vmem:[%s2418_s0 + $0x80] sm:$0xff]  ;;  %v31_v19 = vld [vmem:[%s2418_s0 + $0x98] sm:$0xff] }
  0x19   :  { %v30_v20 = vld [vmem:[%s2418_s0 + $0x90] sm:$0xff]  ;;  %v33_v21 = vld [vmem:[%s2418_s0 + $0xa8] sm:$0xff]  ;;  %v32_v22 = vld [vmem:[%s2418_s0 + $0xa0] sm:$0xff] }
  0x1a   :  { %208 = vperm.xlu1 %1577, %v25_v13   ;;  %203 = vperm.xlu0 %1576, %v24_v14   ;;  %v35_v23 = vld [vmem:[%s2418_s0 + $0xb8] sm:$0xff]  ;;  %v34_v24 = vld [vmem:[%s2418_s0 + $0xb0] sm:$0xff]  ;;  %v37_v25 = vld [vmem:[%s2418_s0 + $0xc8] sm:$0xff] }
  0x1b   :  { %v36_v26 = vld [vmem:[%s2418_s0 + $0xc0] sm:$0xff]  ;;  %v39_v27 = vld [vmem:[%s2418_s0 + $0xd8] sm:$0xff]  ;;  %v38_v28 = vld [vmem:[%s2418_s0 + $0xd0] sm:$0xff] }
  0x1c   :  { %v41_v29 = vld [vmem:[%s2418_s0 + $0xe8] sm:$0xff]  ;;  %v40_v30 = vld [vmem:[%s2418_s0 + $0xe0] sm:$0xff]  ;;  %v43_v31 = vld [vmem:[%s2418_s0 + $0xf8] sm:$0xff] }
  0x1d   :  { %v42_v32 = vld [vmem:[%s2418_s0 + $0xf0] sm:$0xff]  ;;  %v45_v33 = vld [vmem:[%s2418_s0 + $0x108] sm:$0xff]  ;;  %v44_v34 = vld [vmem:[%s2418_s0 + $0x100] sm:$0xff] }
  0x1e   :  { %218 = vperm.xlu1 %1577, %v27_v15   ;;  %213 = vperm.xlu0 %1576, %v26_v16   ;;  %v47_v35 = vld [vmem:[%s2418_s0 + $0x118] sm:$0xff]  ;;  %v46_v36 = vld [vmem:[%s2418_s0 + $0x110] sm:$0xff]  ;;  %v49_v37 = vld [vmem:[%s2418_s0 + $0x128] sm:$0xff] }
  0x1f   :  { %v48_v38 = vld [vmem:[%s2418_s0 + $0x120] sm:$0xff]  ;;  %v51_v39 = vld [vmem:[%s2418_s0 + $0x138] sm:$0xff]  ;;  %v50_v40 = vld [vmem:[%s2418_s0 + $0x130] sm:$0xff] }
  0x20   :  { %v53_v41 = vld [vmem:[%s2418_s0 + $0x148] sm:$0xff]  ;;  %v52_v42 = vld [vmem:[%s2418_s0 + $0x140] sm:$0xff]  ;;  %v55_v43 = vld [vmem:[%s2418_s0 + $0x158] sm:$0xff] }
  0x21   :  { %v54_v44 = vld [vmem:[%s2418_s0 + $0x150] sm:$0xff]  ;;  %v57_v45 = vld [vmem:[%s2418_s0 + $0x168] sm:$0xff]  ;;  %v56_v46 = vld [vmem:[%s2418_s0 + $0x160] sm:$0xff] }
  0x22   :  { %228 = vperm.xlu1 %1577, %v29_v17   ;;  %223 = vperm.xlu0 %1576, %v28_v18   ;;  %v59_v47 = vld [vmem:[%s2418_s0 + $0x178] sm:$0xff]  ;;  %v58_v48 = vld [vmem:[%s2418_s0 + $0x170] sm:$0xff]  ;;  %v61_v49 = vld [vmem:[%s2418_s0 + $0x188] sm:$0xff] }
  0x23   :  { %v60_v50 = vld [vmem:[%s2418_s0 + $0x180] sm:$0xff]  ;;  %v63_v51 = vld [vmem:[%s2418_s0 + $0x198] sm:$0xff]  ;;  %v62_v52 = vld [vmem:[%s2418_s0 + $0x190] sm:$0xff] }
  0x24   :  { %v65_v53 = vld [vmem:[%s2418_s0 + $0x1a8] sm:$0xff]  ;;  %v64_v54 = vld [vmem:[%s2418_s0 + $0x1a0] sm:$0xff]  ;;  %v67_v55 = vld [vmem:[%s2418_s0 + $0x1b8] sm:$0xff] }
  0x25   :  { %v66_v56 = vld [vmem:[%s2418_s0 + $0x1b0] sm:$0xff]  ;;  %v69_v57 = vld [vmem:[%s2418_s0 + $0x1c8] sm:$0xff]  ;;  %v68_v58 = vld [vmem:[%s2418_s0 + $0x1c0] sm:$0xff] }
  0x26   :  { %238 = vperm.xlu1 %1577, %v31_v19   ;;  %233 = vperm.xlu0 %1576, %v30_v20   ;;  %v71_v59 = vld [vmem:[%s2418_s0 + $0x1d8] sm:$0xff]  ;;  %v70_v60 = vld [vmem:[%s2418_s0 + $0x1d0] sm:$0xff]  ;;  %v73_v61 = vld [vmem:[%s2418_s0 + $0x1e8] sm:$0xff] }
  0x27   :  { %v72_v62 = vld [vmem:[%s2418_s0 + $0x1e0] sm:$0xff]  ;;  %v75_v63 = vld [vmem:[%s2418_s0 + $0x1f8] sm:$0xff]  ;;  %v74_v0 = vld [vmem:[%s2418_s0 + $0x1f0] sm:$0xff] }
  0x28   :  { %v2074_v1 = vld [vmem:[%s2419_s1] ss:$0 sm:$0xff]  ;;  %v77_v2 = vld [vmem:[%s2418_s0 + $0x208] sm:$0xff]  ;;  %v79_v8 = vld [vmem:[%s2418_s0 + $0x218] sm:$0xff] }
  0x29   :  { %v76_v3 = vld [vmem:[%s2418_s0 + $0x200] sm:$0xff]  ;;  %v78_v11 = vld [vmem:[%s2418_s0 + $0x210] sm:$0xff]  ;;  %v81_v18 = vld [vmem:[%s2418_s0 + $0x228] sm:$0xff] }
  0x2a   :  { %248 = vperm.xlu1 %1577, %v33_v21   ;;  %243 = vperm.xlu0 %1576, %v32_v22   ;;  %v80_v19 = vld [vmem:[%s2418_s0 + $0x220] sm:$0xff] }
  0x2e   :  { %258 = vperm.xlu1 %1577, %v35_v23   ;;  %253 = vperm.xlu0 %1576, %v34_v24  }
  0x32   :  { %268 = vperm.xlu1 %1577, %v37_v25   ;;  %263 = vperm.xlu0 %1576, %v36_v26  }
  0x36   :  { %278 = vperm.xlu1 %1577, %v39_v27   ;;  %273 = vperm.xlu0 %1576, %v38_v28  }
  0x3a   :  { %288 = vperm.xlu1 %1577, %v41_v29   ;;  %283 = vperm.xlu0 %1576, %v40_v30   ;;  %v83_v30 = vld [vmem:[%s2418_s0 + $0x238] sm:$0xff] }
  0x3e   :  { %298 = vperm.xlu1 %1577, %v43_v31   ;;  %293 = vperm.xlu0 %1576, %v42_v32   ;;  %v82_v31 = vld [vmem:[%s2418_s0 + $0x230] sm:$0xff] }
  0x42   :  { %308 = vperm.xlu1 %1577, %v45_v33   ;;  %303 = vperm.xlu0 %1576, %v44_v34  }
  0x46   :  { %318 = vperm.xlu1 %1577, %v47_v35   ;;  %313 = vperm.xlu0 %1576, %v46_v36  }
  0x4a   :  { %328 = vperm.xlu1 %1577, %v49_v37   ;;  %323 = vperm.xlu0 %1576, %v48_v38  }
  0x4e   :  { %338 = vperm.xlu1 %1577, %v51_v39   ;;  %333 = vperm.xlu0 %1576, %v50_v40  }
  0x52   :  { %348 = vperm.xlu1 %1577, %v53_v41   ;;  %343 = vperm.xlu0 %1576, %v52_v42   ;;  %v85_v42 = vld [vmem:[%s2418_s0 + $0x248] sm:$0xff] }
  0x56   :  { %358 = vperm.xlu1 %1577, %v55_v43   ;;  %353 = vperm.xlu0 %1576, %v54_v44   ;;  %v84_v43 = vld [vmem:[%s2418_s0 + $0x240] sm:$0xff] }
  0x5a   :  { %368 = vperm.xlu1 %1577, %v57_v45   ;;  %363 = vperm.xlu0 %1576, %v56_v46  }
  0x5e   :  { %378 = vperm.xlu1 %1577, %v59_v47   ;;  %373 = vperm.xlu0 %1576, %v58_v48  }
  0x62   :  { %388 = vperm.xlu1 %1577, %v61_v49   ;;  %383 = vperm.xlu0 %1576, %v60_v50  }
  0x66   :  { %398 = vperm.xlu1 %1577, %v63_v51   ;;  %393 = vperm.xlu0 %1576, %v62_v52  }
  0x6a   :  { %408 = vperm.xlu1 %1577, %v65_v53   ;;  %403 = vperm.xlu0 %1576, %v64_v54   ;;  %v87_v54 = vld [vmem:[%s2418_s0 + $0x258] sm:$0xff] }
  0x6e   :  { %418 = vperm.xlu1 %1577, %v67_v55   ;;  %413 = vperm.xlu0 %1576, %v66_v56   ;;  %v86_v55 = vld [vmem:[%s2418_s0 + $0x250] sm:$0xff] }
  0x72   :  { %428 = vperm.xlu1 %1577, %v69_v57   ;;  %423 = vperm.xlu0 %1576, %v68_v58  }
  0x76   :  { %438 = vperm.xlu1 %1577, %v71_v59   ;;  %433 = vperm.xlu0 %1576, %v70_v60  }
  0x7a   :  { %448 = vperm.xlu1 %1577, %v73_v61   ;;  %443 = vperm.xlu0 %1576, %v72_v62  }
  0x7e   :  { %458 = vperm.xlu1 %1577, %v75_v63   ;;  %453 = vperm.xlu0 %1576, %v74_v0  }
  0x81   :  { %v154_v4 = vpop.permute.xlu1 %153  ;;  %v144_v5 = vpop.permute.xlu0 %143 }
  0x82   :  { %v789_v6 = vsub.f32 %v154_v4, %v2074_v1  ;;  %v787_v7 = vsub.f32 %v144_v5, %v2074_v1  ;;  %468 = vperm.xlu1 %1577, %v77_v2   ;;  %463 = vperm.xlu0 %1576, %v76_v3   ;;  %v89_v5 = vld [vmem:[%s2418_s0 + $0x268] sm:$0xff] }
  0x84   :  { %v917_v9 = vmul.f32 -322.58, %v789_v6  ;;  %v915_v10 = vmul.f32 -322.58, %v787_v7 }
  0x85   :  { %v159_v12 = vpop.permute.xlu1 %158  ;;  %v149_v13 = vpop.permute.xlu0 %148 }
  0x86   :  { %v1045_v14 = vmul.f32 %v917_v9, %v789_v6  ;;  %v1043_v15 = vmul.f32 %v915_v10, %v787_v7  ;;  %v790_v16 = vsub.f32 %v159_v12, %v2074_v1  ;;  %v788_v17 = vsub.f32 %v149_v13, %v2074_v1  ;;  %478 = vperm.xlu1 %1577, %v79_v8   ;;  %v88_v6 = vld [vmem:[%s2418_s0 + $0x260] sm:$0xff] }
  0x87   :  { %473 = vperm.xlu0 %1576, %v78_v11  }
  0x88   :  { %v1175_v20 = vmul.f32 1.442695, %v1045_v14  ;;  %v1171_v21 = vmul.f32 1.442695, %v1043_v15  ;;  %v918_v22 = vmul.f32 -322.58, %v790_v16 }
  0x89   :  { %v916_v23 = vmul.f32 -322.58, %v788_v17  ;;  %v169_v24 = vpop.permute.xlu1 %168  ;;  %v164_v25 = vpop.permute.xlu0 %163 }
  0x8a   :  { %1578 = vpow2.f32 %v1175_v20  ;;  %v1046_v26 = vmul.f32 %v918_v22, %v790_v16  ;;  %v792_v27 = vsub.f32 %v169_v24, %v2074_v1  ;;  %v791_v28 = vsub.f32 %v164_v25, %v2074_v1  ;;  %488 = vperm.xlu1 %1577, %v81_v18   ;;  %v90_v20 = vld [vmem:[%s2418_s0 + $0x270] sm:$0xff] }
  0x8b   :  { %1580 = vpow2.f32 %v1171_v21  ;;  %v1044_v29 = vmul.f32 %v916_v23, %v788_v17  ;;  %483 = vperm.xlu0 %1576, %v80_v19   ;;  %v91_v19 = vld [vmem:[%s2418_s0 + $0x278] sm:$0xff] }
  0x8c   :  { %v1177_v32 = vmul.f32 1.442695, %v1046_v26  ;;  %v920_v33 = vmul.f32 -322.58, %v792_v27  ;;  %v919_v34 = vmul.f32 -322.58, %v791_v28 }
  0x8d   :  { %v1173_v35 = vmul.f32 1.442695, %v1044_v29  ;;  %v179_v36 = vpop.permute.xlu1 %178  ;;  %v174_v37 = vpop.permute.xlu0 %173 }
  0x8e   :  { %1582 = vpow2.f32 %v1177_v32  ;;  %v1048_v38 = vmul.f32 %v920_v33, %v792_v27  ;;  %v1047_v39 = vmul.f32 %v919_v34, %v791_v28  ;;  %v794_v40 = vsub.f32 %v179_v36, %v2074_v1  ;;  %498 = vperm.xlu1 %1577, %v83_v30   ;;  %v93_v33 = vld [vmem:[%s2418_s0 + $0x288] sm:$0xff]  ;;  %v92_v34 = vld [vmem:[%s2418_s0 + $0x280] sm:$0xff] }
  0x8f   :  { %1584 = vpow2.f32 %v1173_v35  ;;  %v793_v41 = vsub.f32 %v174_v37, %v2074_v1  ;;  %493 = vperm.xlu0 %1576, %v82_v31  }
  0x90   :  { %v1181_v44 = vmul.f32 1.442695, %v1048_v38  ;;  %v1179_v45 = vmul.f32 1.442695, %v1047_v39  ;;  %v922_v46 = vmul.f32 -322.58, %v794_v40 }
  0x91   :  { %v921_v47 = vmul.f32 -322.58, %v793_v41  ;;  %v189_v48 = vpop.permute.xlu1 %188  ;;  %v184_v49 = vpop.permute.xlu0 %183 }
  0x92   :  { %1586 = vpow2.f32 %v1181_v44  ;;  %v1050_v50 = vmul.f32 %v922_v46, %v794_v40  ;;  %v796_v51 = vsub.f32 %v189_v48, %v2074_v1  ;;  %v795_v52 = vsub.f32 %v184_v49, %v2074_v1  ;;  %508 = vperm.xlu1 %1577, %v85_v42   ;;  %v94_v48 = vld [vmem:[%s2418_s0 + $0x290] sm:$0xff] }
  0x93   :  { %1588 = vpow2.f32 %v1179_v45  ;;  %v1049_v53 = vmul.f32 %v921_v47, %v793_v41  ;;  %503 = vperm.xlu0 %1576, %v84_v43   ;;  %v95_v47 = vld [vmem:[%s2418_s0 + $0x298] sm:$0xff] }
  0x94   :  { %v1579_v56 = vpop.eup %1578  ;;  %v1185_v57 = vmul.f32 1.442695, %v1050_v50  ;;  %v924_v58 = vmul.f32 -322.58, %v796_v51  ;;  %v923_v59 = vmul.f32 -322.58, %v795_v52 }
  0x95   :  { %v1581_v60 = vpop.eup %1580  ;;  %1429 = vst [vmem:[#allocation2 + $0x10] sm:$0xff] %v1579_v56  ;;  %v1183_v61 = vmul.f32 1.442695, %v1049_v53  ;;  %v199_v62 = vpop.permute.xlu1 %198 }
  0x96   :  { %v194_v63 = vpop.permute.xlu0 %193  ;;  %1427 = vst [vmem:[#allocation2] sm:$0xff] %v1581_v60  ;;  %1590 = vpow2.f32 %v1185_v57  ;;  %v1052_v0 = vmul.f32 %v924_v58, %v796_v51  ;;  %v1051_v2 = vmul.f32 %v923_v59, %v795_v52  ;;  %v798_v3 = vsub.f32 %v199_v62, %v2074_v1  ;;  %518 = vperm.xlu1 %1577, %v87_v54   ;;  %v96_v62 = vld [vmem:[%s2418_s0 + $0x2a0] sm:$0xff] }
  0x97   :  { %1592 = vpow2.f32 %v1183_v61  ;;  %v797_v4 = vsub.f32 %v194_v63, %v2074_v1  ;;  %513 = vperm.xlu0 %1576, %v86_v55   ;;  %v97_v61 = vld [vmem:[%s2418_s0 + $0x2a8] sm:$0xff] }
  0x98   :  { %v1583_v7 = vpop.eup %1582  ;;  %v1189_v8 = vmul.f32 1.442695, %v1052_v0  ;;  %v1187_v9 = vmul.f32 1.442695, %v1051_v2  ;;  %v926_v10 = vmul.f32 -322.58, %v798_v3 }
  0x99   :  { %v1585_v11 = vpop.eup %1584  ;;  %1430 = vst [vmem:[#allocation2 + $0x18] sm:$0xff] %v1583_v7  ;;  %v925_v12 = vmul.f32 -322.58, %v797_v4  ;;  %v209_v13 = vpop.permute.xlu1 %208 }
  0x9a   :  { %v204_v14 = vpop.permute.xlu0 %203  ;;  %1428 = vst [vmem:[#allocation2 + $0x8] sm:$0xff] %v1585_v11  ;;  %1594 = vpow2.f32 %v1189_v8  ;;  %v1054_v15 = vmul.f32 %v926_v10, %v798_v3  ;;  %v800_v16 = vsub.f32 %v209_v13, %v2074_v1  ;;  %528 = vperm.xlu1 %1577, %v89_v5   ;;  %v98_v13 = vld [vmem:[%s2418_s0 + $0x2b0] sm:$0xff] }
  0x9b   :  { %v799_v17 = vsub.f32 %v204_v14, %v2074_v1  ;;  %1596 = vpow2.f32 %v1187_v9  ;;  %v1053_v18 = vmul.f32 %v925_v12, %v797_v4  ;;  %523 = vperm.xlu0 %1576, %v88_v6   ;;  %v99_v12 = vld [vmem:[%s2418_s0 + $0x2b8] sm:$0xff] }
  0x9c   :  { %v1587_v21 = vpop.eup %1586  ;;  %v1193_v22 = vmul.f32 1.442695, %v1054_v15  ;;  %v928_v23 = vmul.f32 -322.58, %v800_v16 }
  0x9d   :  { %v927_v24 = vmul.f32 -322.58, %v799_v17  ;;  %v1589_v25 = vpop.eup %1588  ;;  %1432 = vst [vmem:[#allocation2 + $0x28] sm:$0xff] %v1587_v21  ;;  %v1191_v26 = vmul.f32 1.442695, %v1053_v18  ;;  %v219_v27 = vpop.permute.xlu1 %218 }
  0x9e   :  { %v214_v28 = vpop.permute.xlu0 %213  ;;  %1431 = vst [vmem:[#allocation2 + $0x20] sm:$0xff] %v1589_v25  ;;  %1598 = vpow2.f32 %v1193_v22  ;;  %v1056_v29 = vmul.f32 %v928_v23, %v800_v16  ;;  %v802_v31 = vsub.f32 %v219_v27, %v2074_v1  ;;  %538 = vperm.xlu1 %1577, %v91_v19   ;;  %v100_v27 = vld [vmem:[%s2418_s0 + $0x2c0] sm:$0xff] }
  0x9f   :  { %v1055_v30 = vmul.f32 %v927_v24, %v799_v17  ;;  %1600 = vpow2.f32 %v1191_v26  ;;  %v801_v32 = vsub.f32 %v214_v28, %v2074_v1  ;;  %533 = vperm.xlu0 %1576, %v90_v20   ;;  %v101_v26 = vld [vmem:[%s2418_s0 + $0x2c8] sm:$0xff] }
  0xa0   :  { %v1591_v35 = vpop.eup %1590  ;;  %v1197_v36 = vmul.f32 1.442695, %v1056_v29  ;;  %v930_v38 = vmul.f32 -322.58, %v802_v31 }
  0xa1   :  { %v1195_v37 = vmul.f32 1.442695, %v1055_v30  ;;  %v1593_v39 = vpop.eup %1592  ;;  %1434 = vst [vmem:[#allocation2 + $0x38] sm:$0xff] %v1591_v35  ;;  %v929_v40 = vmul.f32 -322.58, %v801_v32  ;;  %v229_v41 = vpop.permute.xlu1 %228 }
  0xa2   :  { %v224_v42 = vpop.permute.xlu0 %223  ;;  %1433 = vst [vmem:[#allocation2 + $0x30] sm:$0xff] %v1593_v39  ;;  %1602 = vpow2.f32 %v1197_v36  ;;  %v1058_v43 = vmul.f32 %v930_v38, %v802_v31  ;;  %v804_v44 = vsub.f32 %v229_v41, %v2074_v1  ;;  %548 = vperm.xlu1 %1577, %v93_v33   ;;  %v102_v41 = vld [vmem:[%s2418_s0 + $0x2d0] sm:$0xff] }
  0xa3   :  { %v803_v45 = vsub.f32 %v224_v42, %v2074_v1  ;;  %1604 = vpow2.f32 %v1195_v37  ;;  %v1057_v46 = vmul.f32 %v929_v40, %v801_v32  ;;  %543 = vperm.xlu0 %1576, %v92_v34   ;;  %v103_v40 = vld [vmem:[%s2418_s0 + $0x2d8] sm:$0xff] }
  0xa4   :  { %v1595_v49 = vpop.eup %1594  ;;  %v1201_v50 = vmul.f32 1.442695, %v1058_v43  ;;  %v932_v51 = vmul.f32 -322.58, %v804_v44 }
  0xa5   :  { %v931_v52 = vmul.f32 -322.58, %v803_v45  ;;  %v1597_v53 = vpop.eup %1596  ;;  %1436 = vst [vmem:[#allocation2 + $0x48] sm:$0xff] %v1595_v49  ;;  %v1199_v54 = vmul.f32 1.442695, %v1057_v46  ;;  %v239_v55 = vpop.permute.xlu1 %238 }
  0xa6   :  { %v234_v56 = vpop.permute.xlu0 %233  ;;  %1435 = vst [vmem:[#allocation2 + $0x40] sm:$0xff] %v1597_v53  ;;  %1606 = vpow2.f32 %v1201_v50  ;;  %v1060_v57 = vmul.f32 %v932_v51, %v804_v44  ;;  %v806_v59 = vsub.f32 %v239_v55, %v2074_v1  ;;  %558 = vperm.xlu1 %1577, %v95_v47   ;;  %v104_v55 = vld [vmem:[%s2418_s0 + $0x2e0] sm:$0xff] }
  0xa7   :  { %v1059_v58 = vmul.f32 %v931_v52, %v803_v45  ;;  %1608 = vpow2.f32 %v1199_v54  ;;  %v805_v60 = vsub.f32 %v234_v56, %v2074_v1  ;;  %553 = vperm.xlu0 %1576, %v94_v48   ;;  %v105_v54 = vld [vmem:[%s2418_s0 + $0x2e8] sm:$0xff] }
  0xa8   :  { %v1599_v63 = vpop.eup %1598  ;;  %v1205_v0 = vmul.f32 1.442695, %v1060_v57  ;;  %v934_v3 = vmul.f32 -322.58, %v806_v59 }
  0xa9   :  { %v1203_v2 = vmul.f32 1.442695, %v1059_v58  ;;  %v1601_v4 = vpop.eup %1600  ;;  %1438 = vst [vmem:[#allocation2 + $0x58] sm:$0xff] %v1599_v63  ;;  %v933_v5 = vmul.f32 -322.58, %v805_v60  ;;  %v249_v6 = vpop.permute.xlu1 %248 }
  0xaa   :  { %v244_v7 = vpop.permute.xlu0 %243  ;;  %1437 = vst [vmem:[#allocation2 + $0x50] sm:$0xff] %v1601_v4  ;;  %1610 = vpow2.f32 %v1205_v0  ;;  %v1062_v8 = vmul.f32 %v934_v3, %v806_v59  ;;  %v808_v9 = vsub.f32 %v249_v6, %v2074_v1  ;;  %568 = vperm.xlu1 %1577, %v97_v61   ;;  %v106_v6 = vld [vmem:[%s2418_s0 + $0x2f0] sm:$0xff] }
  0xab   :  { %v807_v10 = vsub.f32 %v244_v7, %v2074_v1  ;;  %1612 = vpow2.f32 %v1203_v2  ;;  %v1061_v11 = vmul.f32 %v933_v5, %v805_v60  ;;  %563 = vperm.xlu0 %1576, %v96_v62   ;;  %v107_v5 = vld [vmem:[%s2418_s0 + $0x2f8] sm:$0xff] }
  0xac   :  { %v1603_v14 = vpop.eup %1602  ;;  %v1209_v15 = vmul.f32 1.442695, %v1062_v8  ;;  %v936_v16 = vmul.f32 -322.58, %v808_v9 }
  0xad   :  { %v935_v17 = vmul.f32 -322.58, %v807_v10  ;;  %v1605_v18 = vpop.eup %1604  ;;  %1440 = vst [vmem:[#allocation2 + $0x68] sm:$0xff] %v1603_v14  ;;  %v1207_v19 = vmul.f32 1.442695, %v1061_v11  ;;  %v259_v20 = vpop.permute.xlu1 %258 }
  0xae   :  { %v254_v21 = vpop.permute.xlu0 %253  ;;  %1439 = vst [vmem:[#allocation2 + $0x60] sm:$0xff] %v1605_v18  ;;  %1614 = vpow2.f32 %v1209_v15  ;;  %v1064_v22 = vmul.f32 %v936_v16, %v808_v9  ;;  %v810_v24 = vsub.f32 %v259_v20, %v2074_v1  ;;  %578 = vperm.xlu1 %1577, %v99_v12   ;;  %v108_v20 = vld [vmem:[%s2418_s0 + $0x300] sm:$0xff] }
  0xaf   :  { %v1063_v23 = vmul.f32 %v935_v17, %v807_v10  ;;  %1616 = vpow2.f32 %v1207_v19  ;;  %v809_v25 = vsub.f32 %v254_v21, %v2074_v1  ;;  %573 = vperm.xlu0 %1576, %v98_v13   ;;  %v109_v19 = vld [vmem:[%s2418_s0 + $0x308] sm:$0xff] }
  0xb0   :  { %v1607_v28 = vpop.eup %1606  ;;  %v1213_v29 = vmul.f32 1.442695, %v1064_v22  ;;  %v938_v31 = vmul.f32 -322.58, %v810_v24 }
  0xb1   :  { %v1211_v30 = vmul.f32 1.442695, %v1063_v23  ;;  %v1609_v32 = vpop.eup %1608  ;;  %1442 = vst [vmem:[#allocation2 + $0x78] sm:$0xff] %v1607_v28  ;;  %v937_v33 = vmul.f32 -322.58, %v809_v25  ;;  %v269_v34 = vpop.permute.xlu1 %268 }
  0xb2   :  { %v264_v35 = vpop.permute.xlu0 %263  ;;  %1441 = vst [vmem:[#allocation2 + $0x70] sm:$0xff] %v1609_v32  ;;  %1618 = vpow2.f32 %v1213_v29  ;;  %v1066_v36 = vmul.f32 %v938_v31, %v810_v24  ;;  %v812_v37 = vsub.f32 %v269_v34, %v2074_v1  ;;  %588 = vperm.xlu1 %1577, %v101_v26   ;;  %v110_v34 = vld [vmem:[%s2418_s0 + $0x310] sm:$0xff] }
  0xb3   :  { %v811_v38 = vsub.f32 %v264_v35, %v2074_v1  ;;  %1620 = vpow2.f32 %v1211_v30  ;;  %v1065_v39 = vmul.f32 %v937_v33, %v809_v25  ;;  %583 = vperm.xlu0 %1576, %v100_v27   ;;  %v111_v33 = vld [vmem:[%s2418_s0 + $0x318] sm:$0xff] }
  0xb4   :  { %v1611_v42 = vpop.eup %1610  ;;  %v1217_v43 = vmul.f32 1.442695, %v1066_v36  ;;  %v940_v44 = vmul.f32 -322.58, %v812_v37 }
  0xb5   :  { %v939_v45 = vmul.f32 -322.58, %v811_v38  ;;  %v1613_v46 = vpop.eup %1612  ;;  %1444 = vst [vmem:[#allocation2 + $0x88] sm:$0xff] %v1611_v42  ;;  %v1215_v47 = vmul.f32 1.442695, %v1065_v39  ;;  %v279_v48 = vpop.permute.xlu1 %278 }
  0xb6   :  { %v274_v49 = vpop.permute.xlu0 %273  ;;  %1443 = vst [vmem:[#allocation2 + $0x80] sm:$0xff] %v1613_v46  ;;  %1622 = vpow2.f32 %v1217_v43  ;;  %v1068_v50 = vmul.f32 %v940_v44, %v812_v37  ;;  %v814_v52 = vsub.f32 %v279_v48, %v2074_v1  ;;  %598 = vperm.xlu1 %1577, %v103_v40   ;;  %v112_v48 = vld [vmem:[%s2418_s0 + $0x320] sm:$0xff] }
  0xb7   :  { %v1067_v51 = vmul.f32 %v939_v45, %v811_v38  ;;  %1624 = vpow2.f32 %v1215_v47  ;;  %v813_v53 = vsub.f32 %v274_v49, %v2074_v1  ;;  %593 = vperm.xlu0 %1576, %v102_v41   ;;  %v113_v47 = vld [vmem:[%s2418_s0 + $0x328] sm:$0xff] }
  0xb8   :  { %v1615_v56 = vpop.eup %1614  ;;  %v1221_v57 = vmul.f32 1.442695, %v1068_v50  ;;  %v942_v59 = vmul.f32 -322.58, %v814_v52 }
  0xb9   :  { %v1219_v58 = vmul.f32 1.442695, %v1067_v51  ;;  %v1617_v60 = vpop.eup %1616  ;;  %1446 = vst [vmem:[#allocation2 + $0x98] sm:$0xff] %v1615_v56  ;;  %v941_v61 = vmul.f32 -322.58, %v813_v53  ;;  %v289_v62 = vpop.permute.xlu1 %288 }
  0xba   :  { %v284_v63 = vpop.permute.xlu0 %283  ;;  %1445 = vst [vmem:[#allocation2 + $0x90] sm:$0xff] %v1617_v60  ;;  %1626 = vpow2.f32 %v1221_v57  ;;  %v1070_v0 = vmul.f32 %v942_v59, %v814_v52  ;;  %v816_v2 = vsub.f32 %v289_v62, %v2074_v1  ;;  %608 = vperm.xlu1 %1577, %v105_v54   ;;  %v114_v62 = vld [vmem:[%s2418_s0 + $0x330] sm:$0xff] }
  0xbb   :  { %v815_v3 = vsub.f32 %v284_v63, %v2074_v1  ;;  %1628 = vpow2.f32 %v1219_v58  ;;  %v1069_v4 = vmul.f32 %v941_v61, %v813_v53  ;;  %603 = vperm.xlu0 %1576, %v104_v55   ;;  %v115_v61 = vld [vmem:[%s2418_s0 + $0x338] sm:$0xff] }
  0xbc   :  { %v1619_v7 = vpop.eup %1618  ;;  %v1225_v8 = vmul.f32 1.442695, %v1070_v0  ;;  %v944_v9 = vmul.f32 -322.58, %v816_v2 }
  0xbd   :  { %v943_v10 = vmul.f32 -322.58, %v815_v3  ;;  %v1621_v11 = vpop.eup %1620  ;;  %1448 = vst [vmem:[#allocation2 + $0xa8] sm:$0xff] %v1619_v7  ;;  %v1223_v12 = vmul.f32 1.442695, %v1069_v4  ;;  %v299_v13 = vpop.permute.xlu1 %298 }
  0xbe   :  { %v294_v14 = vpop.permute.xlu0 %293  ;;  %1447 = vst [vmem:[#allocation2 + $0xa0] sm:$0xff] %v1621_v11  ;;  %1630 = vpow2.f32 %v1225_v8  ;;  %v1072_v15 = vmul.f32 %v944_v9, %v816_v2  ;;  %v818_v17 = vsub.f32 %v299_v13, %v2074_v1  ;;  %618 = vperm.xlu1 %1577, %v107_v5   ;;  %v116_v13 = vld [vmem:[%s2418_s0 + $0x340] sm:$0xff] }
  0xbf   :  { %v1071_v16 = vmul.f32 %v943_v10, %v815_v3  ;;  %1632 = vpow2.f32 %v1223_v12  ;;  %v817_v18 = vsub.f32 %v294_v14, %v2074_v1  ;;  %613 = vperm.xlu0 %1576, %v106_v6   ;;  %v117_v12 = vld [vmem:[%s2418_s0 + $0x348] sm:$0xff] }
  0xc0   :  { %v1623_v21 = vpop.eup %1622  ;;  %v1229_v22 = vmul.f32 1.442695, %v1072_v15  ;;  %v946_v24 = vmul.f32 -322.58, %v818_v17 }
  0xc1   :  { %v1227_v23 = vmul.f32 1.442695, %v1071_v16  ;;  %v1625_v25 = vpop.eup %1624  ;;  %1450 = vst [vmem:[#allocation2 + $0xb8] sm:$0xff] %v1623_v21  ;;  %v945_v26 = vmul.f32 -322.58, %v817_v18  ;;  %v309_v27 = vpop.permute.xlu1 %308 }
  0xc2   :  { %v304_v28 = vpop.permute.xlu0 %303  ;;  %1449 = vst [vmem:[#allocation2 + $0xb0] sm:$0xff] %v1625_v25  ;;  %1634 = vpow2.f32 %v1229_v22  ;;  %v1074_v29 = vmul.f32 %v946_v24, %v818_v17  ;;  %v820_v30 = vsub.f32 %v309_v27, %v2074_v1  ;;  %628 = vperm.xlu1 %1577, %v109_v19   ;;  %v118_v27 = vld [vmem:[%s2418_s0 + $0x350] sm:$0xff] }
  0xc3   :  { %v819_v31 = vsub.f32 %v304_v28, %v2074_v1  ;;  %1636 = vpow2.f32 %v1227_v23  ;;  %v1073_v32 = vmul.f32 %v945_v26, %v817_v18  ;;  %623 = vperm.xlu0 %1576, %v108_v20   ;;  %v119_v26 = vld [vmem:[%s2418_s0 + $0x358] sm:$0xff] }
  0xc4   :  { %v1627_v35 = vpop.eup %1626  ;;  %v1233_v36 = vmul.f32 1.442695, %v1074_v29  ;;  %v948_v37 = vmul.f32 -322.58, %v820_v30 }
  0xc5   :  { %v947_v38 = vmul.f32 -322.58, %v819_v31  ;;  %v1629_v39 = vpop.eup %1628  ;;  %1452 = vst [vmem:[#allocation2 + $0xc8] sm:$0xff] %v1627_v35  ;;  %v1231_v40 = vmul.f32 1.442695, %v1073_v32  ;;  %v319_v41 = vpop.permute.xlu1 %318 }
  0xc6   :  { %v314_v42 = vpop.permute.xlu0 %313  ;;  %1451 = vst [vmem:[#allocation2 + $0xc0] sm:$0xff] %v1629_v39  ;;  %1638 = vpow2.f32 %v1233_v36  ;;  %v1076_v43 = vmul.f32 %v948_v37, %v820_v30  ;;  %v822_v45 = vsub.f32 %v319_v41, %v2074_v1  ;;  %638 = vperm.xlu1 %1577, %v111_v33   ;;  %v120_v41 = vld [vmem:[%s2418_s0 + $0x360] sm:$0xff] }
  0xc7   :  { %v1075_v44 = vmul.f32 %v947_v38, %v819_v31  ;;  %1640 = vpow2.f32 %v1231_v40  ;;  %v821_v46 = vsub.f32 %v314_v42, %v2074_v1  ;;  %633 = vperm.xlu0 %1576, %v110_v34   ;;  %v121_v40 = vld [vmem:[%s2418_s0 + $0x368] sm:$0xff] }
  0xc8   :  { %v1631_v49 = vpop.eup %1630  ;;  %v1237_v50 = vmul.f32 1.442695, %v1076_v43  ;;  %v950_v52 = vmul.f32 -322.58, %v822_v45 }
  0xc9   :  { %v1235_v51 = vmul.f32 1.442695, %v1075_v44  ;;  %v1633_v53 = vpop.eup %1632  ;;  %1454 = vst [vmem:[#allocation2 + $0xd8] sm:$0xff] %v1631_v49  ;;  %v949_v54 = vmul.f32 -322.58, %v821_v46  ;;  %v329_v55 = vpop.permute.xlu1 %328 }
  0xca   :  { %v324_v56 = vpop.permute.xlu0 %323  ;;  %1453 = vst [vmem:[#allocation2 + $0xd0] sm:$0xff] %v1633_v53  ;;  %1642 = vpow2.f32 %v1237_v50  ;;  %v1078_v57 = vmul.f32 %v950_v52, %v822_v45  ;;  %v824_v58 = vsub.f32 %v329_v55, %v2074_v1  ;;  %648 = vperm.xlu1 %1577, %v113_v47   ;;  %v122_v55 = vld [vmem:[%s2418_s0 + $0x370] sm:$0xff] }
  0xcb   :  { %v823_v59 = vsub.f32 %v324_v56, %v2074_v1  ;;  %1644 = vpow2.f32 %v1235_v51  ;;  %v1077_v60 = vmul.f32 %v949_v54, %v821_v46  ;;  %643 = vperm.xlu0 %1576, %v112_v48   ;;  %v123_v54 = vld [vmem:[%s2418_s0 + $0x378] sm:$0xff] }
  0xcc   :  { %v1635_v63 = vpop.eup %1634  ;;  %v1241_v0 = vmul.f32 1.442695, %v1078_v57  ;;  %v952_v2 = vmul.f32 -322.58, %v824_v58 }
  0xcd   :  { %v951_v3 = vmul.f32 -322.58, %v823_v59  ;;  %v1637_v4 = vpop.eup %1636  ;;  %1456 = vst [vmem:[#allocation2 + $0xe8] sm:$0xff] %v1635_v63  ;;  %v1239_v5 = vmul.f32 1.442695, %v1077_v60  ;;  %v339_v6 = vpop.permute.xlu1 %338 }
  0xce   :  { %v334_v7 = vpop.permute.xlu0 %333  ;;  %1455 = vst [vmem:[#allocation2 + $0xe0] sm:$0xff] %v1637_v4  ;;  %1646 = vpow2.f32 %v1241_v0  ;;  %v1080_v8 = vmul.f32 %v952_v2, %v824_v58  ;;  %v826_v10 = vsub.f32 %v339_v6, %v2074_v1  ;;  %658 = vperm.xlu1 %1577, %v115_v61   ;;  %v124_v6 = vld [vmem:[%s2418_s0 + $0x380] sm:$0xff] }
  0xcf   :  { %v1079_v9 = vmul.f32 %v951_v3, %v823_v59  ;;  %1648 = vpow2.f32 %v1239_v5  ;;  %v825_v11 = vsub.f32 %v334_v7, %v2074_v1  ;;  %653 = vperm.xlu0 %1576, %v114_v62   ;;  %v125_v5 = vld [vmem:[%s2418_s0 + $0x388] sm:$0xff] }
  0xd0   :  { %v1639_v14 = vpop.eup %1638  ;;  %v1245_v15 = vmul.f32 1.442695, %v1080_v8  ;;  %v954_v17 = vmul.f32 -322.58, %v826_v10 }
  0xd1   :  { %v1243_v16 = vmul.f32 1.442695, %v1079_v9  ;;  %v1641_v18 = vpop.eup %1640  ;;  %1458 = vst [vmem:[#allocation2 + $0xf8] sm:$0xff] %v1639_v14  ;;  %v953_v19 = vmul.f32 -322.58, %v825_v11  ;;  %v349_v20 = vpop.permute.xlu1 %348 }
  0xd2   :  { %v344_v21 = vpop.permute.xlu0 %343  ;;  %1457 = vst [vmem:[#allocation2 + $0xf0] sm:$0xff] %v1641_v18  ;;  %1650 = vpow2.f32 %v1245_v15  ;;  %v1082_v22 = vmul.f32 %v954_v17, %v826_v10  ;;  %v828_v23 = vsub.f32 %v349_v20, %v2074_v1  ;;  %668 = vperm.xlu1 %1577, %v117_v12   ;;  %v126_v20 = vld [vmem:[%s2418_s0 + $0x390] sm:$0xff] }
  0xd3   :  { %v827_v24 = vsub.f32 %v344_v21, %v2074_v1  ;;  %1652 = vpow2.f32 %v1243_v16  ;;  %v1081_v25 = vmul.f32 %v953_v19, %v825_v11  ;;  %663 = vperm.xlu0 %1576, %v116_v13   ;;  %v127_v19 = vld [vmem:[%s2418_s0 + $0x398] sm:$0xff] }
  0xd4   :  { %v1643_v28 = vpop.eup %1642  ;;  %v1249_v29 = vmul.f32 1.442695, %v1082_v22  ;;  %v956_v30 = vmul.f32 -322.58, %v828_v23 }
  0xd5   :  { %v955_v31 = vmul.f32 -322.58, %v827_v24  ;;  %v1645_v32 = vpop.eup %1644  ;;  %1460 = vst [vmem:[#allocation2 + $0x108] sm:$0xff] %v1643_v28  ;;  %v1247_v33 = vmul.f32 1.442695, %v1081_v25  ;;  %v359_v34 = vpop.permute.xlu1 %358 }
  0xd6   :  { %v354_v35 = vpop.permute.xlu0 %353  ;;  %1459 = vst [vmem:[#allocation2 + $0x100] sm:$0xff] %v1645_v32  ;;  %1654 = vpow2.f32 %v1249_v29  ;;  %v1084_v36 = vmul.f32 %v956_v30, %v828_v23  ;;  %v830_v38 = vsub.f32 %v359_v34, %v2074_v1  ;;  %678 = vperm.xlu1 %1577, %v119_v26   ;;  %v128_v34 = vld [vmem:[%s2418_s0 + $0x3a0] sm:$0xff] }
  0xd7   :  { %v1083_v37 = vmul.f32 %v955_v31, %v827_v24  ;;  %1656 = vpow2.f32 %v1247_v33  ;;  %v829_v39 = vsub.f32 %v354_v35, %v2074_v1  ;;  %673 = vperm.xlu0 %1576, %v118_v27   ;;  %v129_v33 = vld [vmem:[%s2418_s0 + $0x3a8] sm:$0xff] }
  0xd8   :  { %v1647_v42 = vpop.eup %1646  ;;  %v1253_v43 = vmul.f32 1.442695, %v1084_v36  ;;  %v958_v45 = vmul.f32 -322.58, %v830_v38 }
  0xd9   :  { %v1251_v44 = vmul.f32 1.442695, %v1083_v37  ;;  %v1649_v46 = vpop.eup %1648  ;;  %1462 = vst [vmem:[#allocation2 + $0x118] sm:$0xff] %v1647_v42  ;;  %v957_v47 = vmul.f32 -322.58, %v829_v39  ;;  %v369_v48 = vpop.permute.xlu1 %368 }
  0xda   :  { %v364_v49 = vpop.permute.xlu0 %363  ;;  %1461 = vst [vmem:[#allocation2 + $0x110] sm:$0xff] %v1649_v46  ;;  %1658 = vpow2.f32 %v1253_v43  ;;  %v1086_v50 = vmul.f32 %v958_v45, %v830_v38  ;;  %v832_v51 = vsub.f32 %v369_v48, %v2074_v1  ;;  %688 = vperm.xlu1 %1577, %v121_v40   ;;  %v130_v48 = vld [vmem:[%s2418_s0 + $0x3b0] sm:$0xff] }
  0xdb   :  { %v831_v52 = vsub.f32 %v364_v49, %v2074_v1  ;;  %1660 = vpow2.f32 %v1251_v44  ;;  %v1085_v53 = vmul.f32 %v957_v47, %v829_v39  ;;  %683 = vperm.xlu0 %1576, %v120_v41   ;;  %v131_v47 = vld [vmem:[%s2418_s0 + $0x3b8] sm:$0xff] }
  0xdc   :  { %v1651_v56 = vpop.eup %1650  ;;  %v1257_v57 = vmul.f32 1.442695, %v1086_v50  ;;  %v960_v58 = vmul.f32 -322.58, %v832_v51 }
  0xdd   :  { %v959_v59 = vmul.f32 -322.58, %v831_v52  ;;  %v1653_v60 = vpop.eup %1652  ;;  %1464 = vst [vmem:[#allocation2 + $0x128] sm:$0xff] %v1651_v56  ;;  %v1255_v61 = vmul.f32 1.442695, %v1085_v53  ;;  %v379_v62 = vpop.permute.xlu1 %378 }
  0xde   :  { %v374_v63 = vpop.permute.xlu0 %373  ;;  %1463 = vst [vmem:[#allocation2 + $0x120] sm:$0xff] %v1653_v60  ;;  %1662 = vpow2.f32 %v1257_v57  ;;  %v1088_v0 = vmul.f32 %v960_v58, %v832_v51  ;;  %v834_v3 = vsub.f32 %v379_v62, %v2074_v1  ;;  %698 = vperm.xlu1 %1577, %v123_v54   ;;  %v2301_v58 = vld [vmem:[%s2419_s1] ss:$0 sm:$0xff] }
  0xdf   :  { %v1087_v2 = vmul.f32 %v959_v59, %v831_v52  ;;  %1664 = vpow2.f32 %v1255_v61  ;;  %v833_v4 = vsub.f32 %v374_v63, %v2074_v1  ;;  %693 = vperm.xlu0 %1576, %v122_v55   ;;  %v133_v61 = vld [vmem:[%s2418_s0 + $0x3c8] sm:$0xff]  ;;  %v132_v62 = vld [vmem:[%s2418_s0 + $0x3c0] sm:$0xff] }
  0xe0   :  { %v1655_v7 = vpop.eup %1654  ;;  %v1261_v8 = vmul.f32 1.442695, %v1088_v0  ;;  %v962_v10 = vmul.f32 -322.58, %v834_v3 }
  0xe1   :  { %v1259_v9 = vmul.f32 1.442695, %v1087_v2  ;;  %v1657_v11 = vpop.eup %1656  ;;  %1466 = vst [vmem:[#allocation2 + $0x138] sm:$0xff] %v1655_v7  ;;  %v961_v12 = vmul.f32 -322.58, %v833_v4  ;;  %v389_v13 = vpop.permute.xlu1 %388 }
  0xe2   :  { %v384_v14 = vpop.permute.xlu0 %383  ;;  %1465 = vst [vmem:[#allocation2 + $0x130] sm:$0xff] %v1657_v11  ;;  %1666 = vpow2.f32 %v1261_v8  ;;  %v1090_v15 = vmul.f32 %v962_v10, %v834_v3  ;;  %v836_v16 = vsub.f32 %v389_v13, %v2074_v1  ;;  %708 = vperm.xlu1 %1577, %v125_v5   ;;  %v134_v13 = vld [vmem:[%s2418_s0 + $0x3d0] sm:$0xff] }
  0xe3   :  { %v835_v17 = vsub.f32 %v384_v14, %v2074_v1  ;;  %1668 = vpow2.f32 %v1259_v9  ;;  %v1089_v18 = vmul.f32 %v961_v12, %v833_v4  ;;  %703 = vperm.xlu0 %1576, %v124_v6   ;;  %v135_v12 = vld [vmem:[%s2418_s0 + $0x3d8] sm:$0xff] }
  0xe4   :  { %v1659_v21 = vpop.eup %1658  ;;  %v1265_v22 = vmul.f32 1.442695, %v1090_v15  ;;  %v964_v23 = vmul.f32 -322.58, %v836_v16 }
  0xe5   :  { %v963_v24 = vmul.f32 -322.58, %v835_v17  ;;  %v1661_v25 = vpop.eup %1660  ;;  %1468 = vst [vmem:[#allocation2 + $0x148] sm:$0xff] %v1659_v21  ;;  %v1263_v26 = vmul.f32 1.442695, %v1089_v18  ;;  %v399_v27 = vpop.permute.xlu1 %398 }
  0xe6   :  { %v394_v28 = vpop.permute.xlu0 %393  ;;  %1467 = vst [vmem:[#allocation2 + $0x140] sm:$0xff] %v1661_v25  ;;  %1670 = vpow2.f32 %v1265_v22  ;;  %v1092_v29 = vmul.f32 %v964_v23, %v836_v16  ;;  %v838_v31 = vsub.f32 %v399_v27, %v2074_v1  ;;  %718 = vperm.xlu1 %1577, %v127_v19   ;;  %v136_v27 = vld [vmem:[%s2418_s0 + $0x3e0] sm:$0xff] }
  0xe7   :  { %v1091_v30 = vmul.f32 %v963_v24, %v835_v17  ;;  %1672 = vpow2.f32 %v1263_v26  ;;  %v837_v32 = vsub.f32 %v394_v28, %v2074_v1  ;;  %713 = vperm.xlu0 %1576, %v126_v20   ;;  %v137_v26 = vld [vmem:[%s2418_s0 + $0x3e8] sm:$0xff] }
  0xe8   :  { %v1663_v35 = vpop.eup %1662  ;;  %v1269_v36 = vmul.f32 1.442695, %v1092_v29  ;;  %v966_v38 = vmul.f32 -322.58, %v838_v31 }
  0xe9   :  { %v1267_v37 = vmul.f32 1.442695, %v1091_v30  ;;  %v1665_v39 = vpop.eup %1664  ;;  %1470 = vst [vmem:[#allocation2 + $0x158] sm:$0xff] %v1663_v35  ;;  %v965_v40 = vmul.f32 -322.58, %v837_v32  ;;  %v409_v41 = vpop.permute.xlu1 %408 }
  0xea   :  { %v404_v42 = vpop.permute.xlu0 %403  ;;  %1469 = vst [vmem:[#allocation2 + $0x150] sm:$0xff] %v1665_v39  ;;  %1674 = vpow2.f32 %v1269_v36  ;;  %v1094_v43 = vmul.f32 %v966_v38, %v838_v31  ;;  %v840_v44 = vsub.f32 %v409_v41, %v2074_v1  ;;  %728 = vperm.xlu1 %1577, %v129_v33   ;;  %v138_v41 = vld [vmem:[%s2418_s0 + $0x3f0] sm:$0xff] }
  0xeb   :  { %v839_v45 = vsub.f32 %v404_v42, %v2074_v1  ;;  %1676 = vpow2.f32 %v1267_v37  ;;  %v1093_v46 = vmul.f32 %v965_v40, %v837_v32  ;;  %723 = vperm.xlu0 %1576, %v128_v34   ;;  %v139_v40 = vld [vmem:[%s2418_s0 + $0x3f8] sm:$0xff] }
  0xec   :  { %v1667_v49 = vpop.eup %1666  ;;  %v1273_v50 = vmul.f32 1.442695, %v1094_v43  ;;  %v968_v51 = vmul.f32 -322.58, %v840_v44 }
  0xed   :  { %v967_v52 = vmul.f32 -322.58, %v839_v45  ;;  %v1669_v53 = vpop.eup %1668  ;;  %1472 = vst [vmem:[#allocation2 + $0x168] sm:$0xff] %v1667_v49  ;;  %v1271_v54 = vmul.f32 1.442695, %v1093_v46  ;;  %v419_v1 = vpop.permute.xlu1 %418 }
  0xee   :  { %v414_v55 = vpop.permute.xlu0 %413  ;;  %1471 = vst [vmem:[#allocation2 + $0x160] sm:$0xff] %v1669_v53  ;;  %1678 = vpow2.f32 %v1273_v50  ;;  %v1096_v56 = vmul.f32 %v968_v51, %v840_v44  ;;  %v842_v59 = vsub.f32 %v419_v1, %v2301_v58  ;;  %738 = vperm.xlu1 %1577, %v131_v47  }
  0xef   :  { %v1095_v57 = vmul.f32 %v967_v52, %v839_v45  ;;  %1680 = vpow2.f32 %v1271_v54  ;;  %v841_v60 = vsub.f32 %v414_v55, %v2301_v58  ;;  %733 = vperm.xlu0 %1576, %v130_v48  }
  0xf0   :  { %v1671_v63 = vpop.eup %1670  ;;  %v1277_v0 = vmul.f32 1.442695, %v1096_v56  ;;  %v970_v3 = vmul.f32 -322.58, %v842_v59 }
  0xf1   :  { %v1275_v2 = vmul.f32 1.442695, %v1095_v57  ;;  %v1673_v4 = vpop.eup %1672  ;;  %1474 = vst [vmem:[#allocation2 + $0x178] sm:$0xff] %v1671_v63  ;;  %v969_v5 = vmul.f32 -322.58, %v841_v60  ;;  %v429_v6 = vpop.permute.xlu1 %428 }
  0xf2   :  { %v424_v7 = vpop.permute.xlu0 %423  ;;  %1473 = vst [vmem:[#allocation2 + $0x170] sm:$0xff] %v1673_v4  ;;  %1682 = vpow2.f32 %v1277_v0  ;;  %v1098_v8 = vmul.f32 %v970_v3, %v842_v59  ;;  %v844_v9 = vsub.f32 %v429_v6, %v2301_v58  ;;  %748 = vperm.xlu1 %1577, %v133_v61  }
  0xf3   :  { %v843_v10 = vsub.f32 %v424_v7, %v2301_v58  ;;  %1684 = vpow2.f32 %v1275_v2  ;;  %v1097_v11 = vmul.f32 %v969_v5, %v841_v60  ;;  %743 = vperm.xlu0 %1576, %v132_v62  }
  0xf4   :  { %v1675_v14 = vpop.eup %1674  ;;  %v1281_v15 = vmul.f32 1.442695, %v1098_v8  ;;  %v972_v16 = vmul.f32 -322.58, %v844_v9 }
  0xf5   :  { %v971_v17 = vmul.f32 -322.58, %v843_v10  ;;  %v1677_v18 = vpop.eup %1676  ;;  %1476 = vst [vmem:[#allocation2 + $0x188] sm:$0xff] %v1675_v14  ;;  %v1279_v19 = vmul.f32 1.442695, %v1097_v11  ;;  %v439_v20 = vpop.permute.xlu1 %438 }
  0xf6   :  { %v434_v21 = vpop.permute.xlu0 %433  ;;  %1475 = vst [vmem:[#allocation2 + $0x180] sm:$0xff] %v1677_v18  ;;  %1686 = vpow2.f32 %v1281_v15  ;;  %v1100_v22 = vmul.f32 %v972_v16, %v844_v9  ;;  %v846_v24 = vsub.f32 %v439_v20, %v2301_v58  ;;  %758 = vperm.xlu1 %1577, %v135_v12  }
  0xf7   :  { %v1099_v23 = vmul.f32 %v971_v17, %v843_v10  ;;  %1688 = vpow2.f32 %v1279_v19  ;;  %v845_v25 = vsub.f32 %v434_v21, %v2301_v58  ;;  %753 = vperm.xlu0 %1576, %v134_v13  }
  0xf8   :  { %v1679_v28 = vpop.eup %1678  ;;  %v1285_v29 = vmul.f32 1.442695, %v1100_v22  ;;  %v974_v31 = vmul.f32 -322.58, %v846_v24 }
  0xf9   :  { %v1283_v30 = vmul.f32 1.442695, %v1099_v23  ;;  %v1681_v32 = vpop.eup %1680  ;;  %1478 = vst [vmem:[#allocation2 + $0x198] sm:$0xff] %v1679_v28  ;;  %v973_v33 = vmul.f32 -322.58, %v845_v25  ;;  %v449_v34 = vpop.permute.xlu1 %448 }
  0xfa   :  { %v444_v35 = vpop.permute.xlu0 %443  ;;  %1477 = vst [vmem:[#allocation2 + $0x190] sm:$0xff] %v1681_v32  ;;  %1690 = vpow2.f32 %v1285_v29  ;;  %v1102_v36 = vmul.f32 %v974_v31, %v846_v24  ;;  %v848_v37 = vsub.f32 %v449_v34, %v2301_v58  ;;  %768 = vperm.xlu1 %1577, %v137_v26  }
  0xfb   :  { %v847_v38 = vsub.f32 %v444_v35, %v2301_v58  ;;  %1692 = vpow2.f32 %v1283_v30  ;;  %v1101_v39 = vmul.f32 %v973_v33, %v845_v25  ;;  %763 = vperm.xlu0 %1576, %v136_v27  }
  0xfc   :  { %v1683_v42 = vpop.eup %1682  ;;  %v1289_v43 = vmul.f32 1.442695, %v1102_v36  ;;  %v976_v44 = vmul.f32 -322.58, %v848_v37 }
  0xfd   :  { %v975_v45 = vmul.f32 -322.58, %v847_v38  ;;  %v1685_v46 = vpop.eup %1684  ;;  %1480 = vst [vmem:[#allocation2 + $0x1a8] sm:$0xff] %v1683_v42  ;;  %v1287_v47 = vmul.f32 1.442695, %v1101_v39  ;;  %v459_v48 = vpop.permute.xlu1 %458 }
  0xfe   :  { %v454_v49 = vpop.permute.xlu0 %453  ;;  %1479 = vst [vmem:[#allocation2 + $0x1a0] sm:$0xff] %v1685_v46  ;;  %1694 = vpow2.f32 %v1289_v43  ;;  %v1104_v50 = vmul.f32 %v976_v44, %v848_v37  ;;  %v850_v52 = vsub.f32 %v459_v48, %v2301_v58  ;;  %778 = vperm.xlu1 %1577, %v139_v40  }
  0xff   :  { %v1103_v51 = vmul.f32 %v975_v45, %v847_v38  ;;  %1696 = vpow2.f32 %v1287_v47  ;;  %v849_v53 = vsub.f32 %v454_v49, %v2301_v58  ;;  %773 = vperm.xlu0 %1576, %v138_v41  }
 0x100   :  { %v1687_v54 = vpop.eup %1686  ;;  %v1293_v1 = vmul.f32 1.442695, %v1104_v50  ;;  %v978_v56 = vmul.f32 -322.58, %v850_v52 }
 0x101   :  { %v1291_v55 = vmul.f32 1.442695, %v1103_v51  ;;  %v1689_v57 = vpop.eup %1688  ;;  %1482 = vst [vmem:[#allocation2 + $0x1b8] sm:$0xff] %v1687_v54  ;;  %v977_v59 = vmul.f32 -322.58, %v849_v53  ;;  %v469_v60 = vpop.permute.xlu1 %468 }
 0x102   :  { %v464_v61 = vpop.permute.xlu0 %463  ;;  %1481 = vst [vmem:[#allocation2 + $0x1b0] sm:$0xff] %v1689_v57  ;;  %1698 = vpow2.f32 %v1293_v1  ;;  %v1106_v62 = vmul.f32 %v978_v56, %v850_v52  ;;  %v852_v63 = vsub.f32 %v469_v60, %v2301_v58 }
 0x103   :  { %v851_v0 = vsub.f32 %v464_v61, %v2301_v58  ;;  %1700 = vpow2.f32 %v1291_v55  ;;  %v1105_v2 = vmul.f32 %v977_v59, %v849_v53 }
 0x104   :  { %v1691_v3 = vpop.eup %1690  ;;  %v1297_v4 = vmul.f32 1.442695, %v1106_v62  ;;  %v980_v5 = vmul.f32 -322.58, %v852_v63 }
 0x105   :  { %v979_v6 = vmul.f32 -322.58, %v851_v0  ;;  %v1693_v7 = vpop.eup %1692  ;;  %1484 = vst [vmem:[#allocation2 + $0x1c8] sm:$0xff] %v1691_v3  ;;  %v1295_v8 = vmul.f32 1.442695, %v1105_v2  ;;  %v479_v9 = vpop.permute.xlu1 %478 }
 0x106   :  { %1483 = vst [vmem:[#allocation2 + $0x1c0] sm:$0xff] %v1693_v7  ;;  %1702 = vpow2.f32 %v1297_v4  ;;  %v1108_v10 = vmul.f32 %v980_v5, %v852_v63  ;;  %v854_v12 = vsub.f32 %v479_v9, %v2301_v58  ;;  %v474_v13 = vpop.permute.xlu0 %473 }
 0x107   :  { %v1107_v11 = vmul.f32 %v979_v6, %v851_v0  ;;  %1704 = vpow2.f32 %v1295_v8  ;;  %v853_v14 = vsub.f32 %v474_v13, %v2301_v58 }
 0x108   :  { %v1695_v15 = vpop.eup %1694  ;;  %v1301_v16 = vmul.f32 1.442695, %v1108_v10  ;;  %v982_v18 = vmul.f32 -322.58, %v854_v12 }
 0x109   :  { %v1299_v17 = vmul.f32 1.442695, %v1107_v11  ;;  %v1697_v19 = vpop.eup %1696  ;;  %1486 = vst [vmem:[#allocation2 + $0x1d8] sm:$0xff] %v1695_v15  ;;  %v981_v20 = vmul.f32 -322.58, %v853_v14  ;;  %v489_v21 = vpop.permute.xlu1 %488 }
 0x10a   :  { %1485 = vst [vmem:[#allocation2 + $0x1d0] sm:$0xff] %v1697_v19  ;;  %1706 = vpow2.f32 %v1301_v16  ;;  %v1110_v22 = vmul.f32 %v982_v18, %v854_v12  ;;  %v856_v23 = vsub.f32 %v489_v21, %v2301_v58  ;;  %v484_v24 = vpop.permute.xlu0 %483 }
 0x10b   :  { %1708 = vpow2.f32 %v1299_v17  ;;  %v1109_v25 = vmul.f32 %v981_v20, %v853_v14  ;;  %v855_v26 = vsub.f32 %v484_v24, %v2301_v58 }
 0x10c   :  { %v1699_v27 = vpop.eup %1698  ;;  %v1305_v28 = vmul.f32 1.442695, %v1110_v22  ;;  %v984_v29 = vmul.f32 -322.58, %v856_v23 }
 0x10d   :  { %v1701_v30 = vpop.eup %1700  ;;  %1488 = vst [vmem:[#allocation2 + $0x1e8] sm:$0xff] %v1699_v27  ;;  %v1303_v31 = vmul.f32 1.442695, %v1109_v25  ;;  %v983_v32 = vmul.f32 -322.58, %v855_v26  ;;  %v499_v33 = vpop.permute.xlu1 %498 }
 0x10e   :  { %1487 = vst [vmem:[#allocation2 + $0x1e0] sm:$0xff] %v1701_v30  ;;  %1710 = vpow2.f32 %v1305_v28  ;;  %v1112_v34 = vmul.f32 %v984_v29, %v856_v23  ;;  %v858_v35 = vsub.f32 %v499_v33, %v2301_v58  ;;  %v494_v36 = vpop.permute.xlu0 %493 }
 0x10f   :  { %1712 = vpow2.f32 %v1303_v31  ;;  %v1111_v37 = vmul.f32 %v983_v32, %v855_v26  ;;  %v857_v38 = vsub.f32 %v494_v36, %v2301_v58 }
 0x110   :  { %v1703_v39 = vpop.eup %1702  ;;  %v1309_v40 = vmul.f32 1.442695, %v1112_v34  ;;  %v986_v41 = vmul.f32 -322.58, %v858_v35 }
 0x111   :  { %v1705_v42 = vpop.eup %1704  ;;  %1490 = vst [vmem:[#allocation2 + $0x1f8] sm:$0xff] %v1703_v39  ;;  %v1307_v43 = vmul.f32 1.442695, %v1111_v37  ;;  %v985_v44 = vmul.f32 -322.58, %v857_v38  ;;  %v509_v45 = vpop.permute.xlu1 %508 }
 0x112   :  { %1489 = vst [vmem:[#allocation2 + $0x1f0] sm:$0xff] %v1705_v42  ;;  %1714 = vpow2.f32 %v1309_v40  ;;  %v1114_v46 = vmul.f32 %v986_v41, %v858_v35  ;;  %v860_v47 = vsub.f32 %v509_v45, %v2301_v58  ;;  %v504_v48 = vpop.permute.xlu0 %503 }
 0x113   :  { %1716 = vpow2.f32 %v1307_v43  ;;  %v1113_v49 = vmul.f32 %v985_v44, %v857_v38  ;;  %v859_v50 = vsub.f32 %v504_v48, %v2301_v58 }
 0x114   :  { %v1707_v51 = vpop.eup %1706  ;;  %v1313_v52 = vmul.f32 1.442695, %v1114_v46  ;;  %v988_v53 = vmul.f32 -322.58, %v860_v47 }
 0x115   :  { %v1709_v54 = vpop.eup %1708  ;;  %1492 = vst [vmem:[#allocation2 + $0x208] sm:$0xff] %v1707_v51  ;;  %v1311_v1 = vmul.f32 1.442695, %v1113_v49  ;;  %v987_v55 = vmul.f32 -322.58, %v859_v50  ;;  %v519_v56 = vpop.permute.xlu1 %518 }
 0x116   :  { %1491 = vst [vmem:[#allocation2 + $0x200] sm:$0xff] %v1709_v54  ;;  %1718 = vpow2.f32 %v1313_v52  ;;  %v1116_v57 = vmul.f32 %v988_v53, %v860_v47  ;;  %v862_v59 = vsub.f32 %v519_v56, %v2301_v58  ;;  %v514_v60 = vpop.permute.xlu0 %513 }
 0x117   :  { %1720 = vpow2.f32 %v1311_v1  ;;  %v1115_v61 = vmul.f32 %v987_v55, %v859_v50  ;;  %v861_v62 = vsub.f32 %v514_v60, %v2301_v58 }
 0x118   :  { %v1711_v63 = vpop.eup %1710  ;;  %v1317_v0 = vmul.f32 1.442695, %v1116_v57  ;;  %v990_v2 = vmul.f32 -322.58, %v862_v59 }
 0x119   :  { %v1713_v3 = vpop.eup %1712  ;;  %1494 = vst [vmem:[#allocation2 + $0x218] sm:$0xff] %v1711_v63  ;;  %v1315_v4 = vmul.f32 1.442695, %v1115_v61  ;;  %v989_v5 = vmul.f32 -322.58, %v861_v62  ;;  %v529_v6 = vpop.permute.xlu1 %528 }
 0x11a   :  { %1493 = vst [vmem:[#allocation2 + $0x210] sm:$0xff] %v1713_v3  ;;  %1722 = vpow2.f32 %v1317_v0  ;;  %v1118_v7 = vmul.f32 %v990_v2, %v862_v59  ;;  %v864_v8 = vsub.f32 %v529_v6, %v2301_v58  ;;  %v524_v9 = vpop.permute.xlu0 %523 }
 0x11b   :  { %1724 = vpow2.f32 %v1315_v4  ;;  %v1117_v10 = vmul.f32 %v989_v5, %v861_v62  ;;  %v863_v11 = vsub.f32 %v524_v9, %v2301_v58 }
 0x11c   :  { %v1715_v12 = vpop.eup %1714  ;;  %v1321_v13 = vmul.f32 1.442695, %v1118_v7  ;;  %v992_v14 = vmul.f32 -322.58, %v864_v8 }
 0x11d   :  { %v1717_v15 = vpop.eup %1716  ;;  %1496 = vst [vmem:[#allocation2 + $0x228] sm:$0xff] %v1715_v12  ;;  %v1319_v16 = vmul.f32 1.442695, %v1117_v10  ;;  %v991_v17 = vmul.f32 -322.58, %v863_v11  ;;  %v539_v18 = vpop.permute.xlu1 %538 }
 0x11e   :  { %1495 = vst [vmem:[#allocation2 + $0x220] sm:$0xff] %v1717_v15  ;;  %1726 = vpow2.f32 %v1321_v13  ;;  %v1120_v19 = vmul.f32 %v992_v14, %v864_v8  ;;  %v866_v20 = vsub.f32 %v539_v18, %v2301_v58  ;;  %v534_v21 = vpop.permute.xlu0 %533 }
 0x11f   :  { %1728 = vpow2.f32 %v1319_v16  ;;  %v1119_v22 = vmul.f32 %v991_v17, %v863_v11  ;;  %v865_v23 = vsub.f32 %v534_v21, %v2301_v58 }
 0x120   :  { %v1719_v24 = vpop.eup %1718  ;;  %v1325_v25 = vmul.f32 1.442695, %v1120_v19  ;;  %v994_v26 = vmul.f32 -322.58, %v866_v20 }
 0x121   :  { %v1721_v27 = vpop.eup %1720  ;;  %1498 = vst [vmem:[#allocation2 + $0x238] sm:$0xff] %v1719_v24  ;;  %v1323_v28 = vmul.f32 1.442695, %v1119_v22  ;;  %v993_v29 = vmul.f32 -322.58, %v865_v23  ;;  %v549_v30 = vpop.permute.xlu1 %548 }
 0x122   :  { %1497 = vst [vmem:[#allocation2 + $0x230] sm:$0xff] %v1721_v27  ;;  %1730 = vpow2.f32 %v1325_v25  ;;  %v1122_v31 = vmul.f32 %v994_v26, %v866_v20  ;;  %v868_v32 = vsub.f32 %v549_v30, %v2301_v58  ;;  %v544_v33 = vpop.permute.xlu0 %543 }
 0x123   :  { %1732 = vpow2.f32 %v1323_v28  ;;  %v1121_v34 = vmul.f32 %v993_v29, %v865_v23  ;;  %v867_v35 = vsub.f32 %v544_v33, %v2301_v58 }
 0x124   :  { %v1723_v36 = vpop.eup %1722  ;;  %v1329_v37 = vmul.f32 1.442695, %v1122_v31  ;;  %v996_v38 = vmul.f32 -322.58, %v868_v32 }
 0x125   :  { %v1725_v39 = vpop.eup %1724  ;;  %1500 = vst [vmem:[#allocation2 + $0x248] sm:$0xff] %v1723_v36  ;;  %v1327_v40 = vmul.f32 1.442695, %v1121_v34  ;;  %v995_v41 = vmul.f32 -322.58, %v867_v35  ;;  %v559_v42 = vpop.permute.xlu1 %558 }
 0x126   :  { %1499 = vst [vmem:[#allocation2 + $0x240] sm:$0xff] %v1725_v39  ;;  %1734 = vpow2.f32 %v1329_v37  ;;  %v1124_v43 = vmul.f32 %v996_v38, %v868_v32  ;;  %v870_v44 = vsub.f32 %v559_v42, %v2301_v58  ;;  %v554_v45 = vpop.permute.xlu0 %553 }
 0x127   :  { %1736 = vpow2.f32 %v1327_v40  ;;  %v1123_v46 = vmul.f32 %v995_v41, %v867_v35  ;;  %v869_v47 = vsub.f32 %v554_v45, %v2301_v58 }
 0x128   :  { %v1727_v48 = vpop.eup %1726  ;;  %v1333_v49 = vmul.f32 1.442695, %v1124_v43  ;;  %v998_v50 = vmul.f32 -322.58, %v870_v44 }
 0x129   :  { %v1729_v51 = vpop.eup %1728  ;;  %1502 = vst [vmem:[#allocation2 + $0x258] sm:$0xff] %v1727_v48  ;;  %v1331_v52 = vmul.f32 1.442695, %v1123_v46  ;;  %v997_v53 = vmul.f32 -322.58, %v869_v47  ;;  %v569_v54 = vpop.permute.xlu1 %568 }
 0x12a   :  { %1501 = vst [vmem:[#allocation2 + $0x250] sm:$0xff] %v1729_v51  ;;  %1738 = vpow2.f32 %v1333_v49  ;;  %v1126_v1 = vmul.f32 %v998_v50, %v870_v44  ;;  %v872_v55 = vsub.f32 %v569_v54, %v2301_v58  ;;  %v564_v56 = vpop.permute.xlu0 %563 }
 0x12b   :  { %1740 = vpow2.f32 %v1331_v52  ;;  %v1125_v57 = vmul.f32 %v997_v53, %v869_v47  ;;  %v871_v59 = vsub.f32 %v564_v56, %v2301_v58 }
 0x12c   :  { %v1731_v60 = vpop.eup %1730  ;;  %v1337_v61 = vmul.f32 1.442695, %v1126_v1  ;;  %v1000_v62 = vmul.f32 -322.58, %v872_v55 }
 0x12d   :  { %v1733_v63 = vpop.eup %1732  ;;  %1504 = vst [vmem:[#allocation2 + $0x268] sm:$0xff] %v1731_v60  ;;  %v1335_v0 = vmul.f32 1.442695, %v1125_v57  ;;  %v999_v2 = vmul.f32 -322.58, %v871_v59  ;;  %v579_v3 = vpop.permute.xlu1 %578 }
 0x12e   :  { %1503 = vst [vmem:[#allocation2 + $0x260] sm:$0xff] %v1733_v63  ;;  %1742 = vpow2.f32 %v1337_v61  ;;  %v1128_v4 = vmul.f32 %v1000_v62, %v872_v55  ;;  %v874_v5 = vsub.f32 %v579_v3, %v2301_v58  ;;  %v574_v6 = vpop.permute.xlu0 %573 }
 0x12f   :  { %1744 = vpow2.f32 %v1335_v0  ;;  %v1127_v7 = vmul.f32 %v999_v2, %v871_v59  ;;  %v873_v8 = vsub.f32 %v574_v6, %v2301_v58 }
 0x130   :  { %v1735_v9 = vpop.eup %1734  ;;  %v1341_v10 = vmul.f32 1.442695, %v1128_v4  ;;  %v1002_v11 = vmul.f32 -322.58, %v874_v5 }
 0x131   :  { %v1737_v12 = vpop.eup %1736  ;;  %1506 = vst [vmem:[#allocation2 + $0x278] sm:$0xff] %v1735_v9  ;;  %v1339_v13 = vmul.f32 1.442695, %v1127_v7  ;;  %v1001_v14 = vmul.f32 -322.58, %v873_v8  ;;  %v589_v15 = vpop.permute.xlu1 %588 }
 0x132   :  { %1505 = vst [vmem:[#allocation2 + $0x270] sm:$0xff] %v1737_v12  ;;  %1746 = vpow2.f32 %v1341_v10  ;;  %v1130_v16 = vmul.f32 %v1002_v11, %v874_v5  ;;  %v876_v17 = vsub.f32 %v589_v15, %v2301_v58  ;;  %v584_v18 = vpop.permute.xlu0 %583 }
 0x133   :  { %1748 = vpow2.f32 %v1339_v13  ;;  %v1129_v19 = vmul.f32 %v1001_v14, %v873_v8  ;;  %v875_v20 = vsub.f32 %v584_v18, %v2301_v58 }
 0x134   :  { %v1739_v21 = vpop.eup %1738  ;;  %v1345_v22 = vmul.f32 1.442695, %v1130_v16  ;;  %v1004_v23 = vmul.f32 -322.58, %v876_v17 }
 0x135   :  { %v1741_v24 = vpop.eup %1740  ;;  %1508 = vst [vmem:[#allocation2 + $0x288] sm:$0xff] %v1739_v21  ;;  %v1343_v25 = vmul.f32 1.442695, %v1129_v19  ;;  %v1003_v26 = vmul.f32 -322.58, %v875_v20  ;;  %v599_v27 = vpop.permute.xlu1 %598 }
 0x136   :  { %1507 = vst [vmem:[#allocation2 + $0x280] sm:$0xff] %v1741_v24  ;;  %1750 = vpow2.f32 %v1345_v22  ;;  %v1132_v28 = vmul.f32 %v1004_v23, %v876_v17  ;;  %v878_v29 = vsub.f32 %v599_v27, %v2301_v58  ;;  %v594_v30 = vpop.permute.xlu0 %593 }
 0x137   :  { %1752 = vpow2.f32 %v1343_v25  ;;  %v1131_v31 = vmul.f32 %v1003_v26, %v875_v20  ;;  %v877_v32 = vsub.f32 %v594_v30, %v2301_v58 }
 0x138   :  { %v1743_v33 = vpop.eup %1742  ;;  %v1349_v34 = vmul.f32 1.442695, %v1132_v28  ;;  %v1006_v35 = vmul.f32 -322.58, %v878_v29 }
 0x139   :  { %v1745_v36 = vpop.eup %1744  ;;  %1510 = vst [vmem:[#allocation2 + $0x298] sm:$0xff] %v1743_v33  ;;  %v1347_v37 = vmul.f32 1.442695, %v1131_v31  ;;  %v1005_v38 = vmul.f32 -322.58, %v877_v32  ;;  %v609_v39 = vpop.permute.xlu1 %608 }
 0x13a   :  { %1509 = vst [vmem:[#allocation2 + $0x290] sm:$0xff] %v1745_v36  ;;  %1754 = vpow2.f32 %v1349_v34  ;;  %v1134_v40 = vmul.f32 %v1006_v35, %v878_v29  ;;  %v880_v41 = vsub.f32 %v609_v39, %v2301_v58  ;;  %v604_v42 = vpop.permute.xlu0 %603 }
 0x13b   :  { %1756 = vpow2.f32 %v1347_v37  ;;  %v1133_v43 = vmul.f32 %v1005_v38, %v877_v32  ;;  %v879_v44 = vsub.f32 %v604_v42, %v2301_v58 }
 0x13c   :  { %v1747_v45 = vpop.eup %1746  ;;  %v1353_v46 = vmul.f32 1.442695, %v1134_v40  ;;  %v1008_v47 = vmul.f32 -322.58, %v880_v41 }
 0x13d   :  { %v1749_v48 = vpop.eup %1748  ;;  %1512 = vst [vmem:[#allocation2 + $0x2a8] sm:$0xff] %v1747_v45  ;;  %v1351_v49 = vmul.f32 1.442695, %v1133_v43  ;;  %v1007_v50 = vmul.f32 -322.58, %v879_v44  ;;  %v619_v51 = vpop.permute.xlu1 %618 }
 0x13e   :  { %1511 = vst [vmem:[#allocation2 + $0x2a0] sm:$0xff] %v1749_v48  ;;  %1758 = vpow2.f32 %v1353_v46  ;;  %v1136_v52 = vmul.f32 %v1008_v47, %v880_v41  ;;  %v882_v53 = vsub.f32 %v619_v51, %v2301_v58  ;;  %v614_v54 = vpop.permute.xlu0 %613 }
 0x13f   :  { %1760 = vpow2.f32 %v1351_v49  ;;  %v1135_v1 = vmul.f32 %v1007_v50, %v879_v44  ;;  %v881_v55 = vsub.f32 %v614_v54, %v2301_v58 }
 0x140   :  { %v1751_v56 = vpop.eup %1750  ;;  %v1357_v57 = vmul.f32 1.442695, %v1136_v52  ;;  %v1010_v59 = vmul.f32 -322.58, %v882_v53 }
 0x141   :  { %v1753_v60 = vpop.eup %1752  ;;  %1514 = vst [vmem:[#allocation2 + $0x2b8] sm:$0xff] %v1751_v56  ;;  %v1355_v61 = vmul.f32 1.442695, %v1135_v1  ;;  %v1009_v62 = vmul.f32 -322.58, %v881_v55  ;;  %v629_v63 = vpop.permute.xlu1 %628 }
 0x142   :  { %1513 = vst [vmem:[#allocation2 + $0x2b0] sm:$0xff] %v1753_v60  ;;  %1762 = vpow2.f32 %v1357_v57  ;;  %v1138_v0 = vmul.f32 %v1010_v59, %v882_v53  ;;  %v884_v2 = vsub.f32 %v629_v63, %v2301_v58  ;;  %v624_v3 = vpop.permute.xlu0 %623 }
 0x143   :  { %1764 = vpow2.f32 %v1355_v61  ;;  %v1137_v4 = vmul.f32 %v1009_v62, %v881_v55  ;;  %v883_v5 = vsub.f32 %v624_v3, %v2301_v58 }
 0x144   :  { %v1755_v6 = vpop.eup %1754  ;;  %v1361_v7 = vmul.f32 1.442695, %v1138_v0  ;;  %v1012_v8 = vmul.f32 -322.58, %v884_v2 }
 0x145   :  { %v1757_v9 = vpop.eup %1756  ;;  %1516 = vst [vmem:[#allocation2 + $0x2c8] sm:$0xff] %v1755_v6  ;;  %v1359_v10 = vmul.f32 1.442695, %v1137_v4  ;;  %v1011_v11 = vmul.f32 -322.58, %v883_v5  ;;  %v639_v12 = vpop.permute.xlu1 %638 }
 0x146   :  { %1515 = vst [vmem:[#allocation2 + $0x2c0] sm:$0xff] %v1757_v9  ;;  %1766 = vpow2.f32 %v1361_v7  ;;  %v1140_v13 = vmul.f32 %v1012_v8, %v884_v2  ;;  %v886_v14 = vsub.f32 %v639_v12, %v2301_v58  ;;  %v634_v15 = vpop.permute.xlu0 %633 }
 0x147   :  { %1768 = vpow2.f32 %v1359_v10  ;;  %v1139_v16 = vmul.f32 %v1011_v11, %v883_v5  ;;  %v885_v17 = vsub.f32 %v634_v15, %v2301_v58 }
 0x148   :  { %v1759_v18 = vpop.eup %1758  ;;  %v1365_v19 = vmul.f32 1.442695, %v1140_v13  ;;  %v1014_v20 = vmul.f32 -322.58, %v886_v14 }
 0x149   :  { %v1761_v21 = vpop.eup %1760  ;;  %1518 = vst [vmem:[#allocation2 + $0x2d8] sm:$0xff] %v1759_v18  ;;  %v1363_v22 = vmul.f32 1.442695, %v1139_v16  ;;  %v1013_v23 = vmul.f32 -322.58, %v885_v17  ;;  %v649_v24 = vpop.permute.xlu1 %648 }
 0x14a   :  { %1517 = vst [vmem:[#allocation2 + $0x2d0] sm:$0xff] %v1761_v21  ;;  %1770 = vpow2.f32 %v1365_v19  ;;  %v1142_v25 = vmul.f32 %v1014_v20, %v886_v14  ;;  %v888_v26 = vsub.f32 %v649_v24, %v2301_v58  ;;  %v644_v27 = vpop.permute.xlu0 %643 }
 0x14b   :  { %1772 = vpow2.f32 %v1363_v22  ;;  %v1141_v28 = vmul.f32 %v1013_v23, %v885_v17  ;;  %v887_v29 = vsub.f32 %v644_v27, %v2301_v58 }
 0x14c   :  { %v1763_v30 = vpop.eup %1762  ;;  %v1369_v31 = vmul.f32 1.442695, %v1142_v25  ;;  %v1016_v32 = vmul.f32 -322.58, %v888_v26 }
 0x14d   :  { %v1765_v33 = vpop.eup %1764  ;;  %1520 = vst [vmem:[#allocation2 + $0x2e8] sm:$0xff] %v1763_v30  ;;  %v1367_v34 = vmul.f32 1.442695, %v1141_v28  ;;  %v1015_v35 = vmul.f32 -322.58, %v887_v29  ;;  %v659_v36 = vpop.permute.xlu1 %658 }
 0x14e   :  { %1519 = vst [vmem:[#allocation2 + $0x2e0] sm:$0xff] %v1765_v33  ;;  %1774 = vpow2.f32 %v1369_v31  ;;  %v1144_v37 = vmul.f32 %v1016_v32, %v888_v26  ;;  %v890_v38 = vsub.f32 %v659_v36, %v2301_v58  ;;  %v654_v39 = vpop.permute.xlu0 %653 }
 0x14f   :  { %1776 = vpow2.f32 %v1367_v34  ;;  %v1143_v40 = vmul.f32 %v1015_v35, %v887_v29  ;;  %v889_v41 = vsub.f32 %v654_v39, %v2301_v58 }
 0x150   :  { %v1767_v42 = vpop.eup %1766  ;;  %v1373_v43 = vmul.f32 1.442695, %v1144_v37  ;;  %v1018_v44 = vmul.f32 -322.58, %v890_v38 }
 0x151   :  { %v1769_v45 = vpop.eup %1768  ;;  %1522 = vst [vmem:[#allocation2 + $0x2f8] sm:$0xff] %v1767_v42  ;;  %v1371_v46 = vmul.f32 1.442695, %v1143_v40  ;;  %v1017_v47 = vmul.f32 -322.58, %v889_v41  ;;  %v669_v48 = vpop.permute.xlu1 %668 }
 0x152   :  { %1521 = vst [vmem:[#allocation2 + $0x2f0] sm:$0xff] %v1769_v45  ;;  %1778 = vpow2.f32 %v1373_v43  ;;  %v1146_v49 = vmul.f32 %v1018_v44, %v890_v38  ;;  %v892_v50 = vsub.f32 %v669_v48, %v2301_v58  ;;  %v664_v51 = vpop.permute.xlu0 %663 }
 0x153   :  { %1780 = vpow2.f32 %v1371_v46  ;;  %v1145_v52 = vmul.f32 %v1017_v47, %v889_v41  ;;  %v891_v53 = vsub.f32 %v664_v51, %v2301_v58 }
 0x154   :  { %v1771_v54 = vpop.eup %1770  ;;  %v1377_v1 = vmul.f32 1.442695, %v1146_v49  ;;  %v1020_v55 = vmul.f32 -322.58, %v892_v50 }
 0x155   :  { %v1773_v56 = vpop.eup %1772  ;;  %1524 = vst [vmem:[#allocation2 + $0x308] sm:$0xff] %v1771_v54  ;;  %v1375_v57 = vmul.f32 1.442695, %v1145_v52  ;;  %v1019_v59 = vmul.f32 -322.58, %v891_v53  ;;  %v679_v60 = vpop.permute.xlu1 %678 }
 0x156   :  { %1523 = vst [vmem:[#allocation2 + $0x300] sm:$0xff] %v1773_v56  ;;  %1782 = vpow2.f32 %v1377_v1  ;;  %v1148_v61 = vmul.f32 %v1020_v55, %v892_v50  ;;  %v894_v62 = vsub.f32 %v679_v60, %v2301_v58  ;;  %v674_v63 = vpop.permute.xlu0 %673 }
 0x157   :  { %1784 = vpow2.f32 %v1375_v57  ;;  %v1147_v0 = vmul.f32 %v1019_v59, %v891_v53  ;;  %v893_v2 = vsub.f32 %v674_v63, %v2301_v58  ;;  %v2392_v59 = vld [vmem:[%s2419_s1] ss:$0 sm:$0xff]  ;;  %s1861_s1 = smov [#allocation2]  }
 0x158   :  { %v1775_v3 = vpop.eup %1774  ;;  %v1381_v4 = vmul.f32 1.442695, %v1148_v61  ;;  %v1022_v5 = vmul.f32 -322.58, %v894_v62  ;;  %s1560_s18 = sshll.u32 %s1861_s1, 4  ;;  %s1561_s18 = int_to_ptr.vmem [resolvable:$true] %s1560_s18 }
 0x159   :  { %v1777_v6 = vpop.eup %1776  ;;  %1526 = vst [vmem:[#allocation2 + $0x318] sm:$0xff] %v1775_v3  ;;  %v1379_v7 = vmul.f32 1.442695, %v1147_v0  ;;  %v1021_v8 = vmul.f32 -322.58, %v893_v2  ;;  %v689_v9 = vpop.permute.xlu1 %688  ;;  %s1836_s19 = scalar_lea.vmem %s1561_s18, 16384  ;;  %p1841_p1 = scmp.lt.s32.totalorder %s1561_s18, %s1561_s18 }
 0x15a   :  { %1525 = vst [vmem:[#allocation2 + $0x310] sm:$0xff] %v1777_v6  ;;  %1786 = vpow2.f32 %v1381_v4  ;;  %v1150_v10 = vmul.f32 %v1022_v5, %v894_v62  ;;  %v896_v11 = vsub.f32 %v689_v9, %v2301_v58  ;;  %v684_v12 = vpop.permute.xlu0 %683  ;;  %p1837_p0 = scmp.ne.s32.totalorder %s1561_s18, %s1836_s19  ;;  %p1842_p2 = scmp.lt.s32.totalorder %s1836_s19, %s1836_s19 }
 0x15b   :  { %1788 = vpow2.f32 %v1379_v7  ;;  %v1149_v13 = vmul.f32 %v1021_v8, %v893_v2  ;;  %v895_v14 = vsub.f32 %v684_v12, %v2301_v58 }
 0x15c   :  { %v1779_v15 = vpop.eup %1778  ;;  %v1385_v16 = vmul.f32 1.442695, %v1150_v10  ;;  %v1024_v17 = vmul.f32 -322.58, %v896_v11  ;;  %p1843_p3 = por %p1842_p2, %p1841_p1 }
 0x15d   :  { %v1781_v18 = vpop.eup %1780  ;;  %1528 = vst [vmem:[#allocation2 + $0x328] sm:$0xff] %v1779_v15  ;;  %v1383_v19 = vmul.f32 1.442695, %v1149_v13  ;;  %v1023_v20 = vmul.f32 -322.58, %v895_v14  ;;  %v699_v21 = vpop.permute.xlu1 %698 }
 0x15e   :  { %1527 = vst [vmem:[#allocation2 + $0x320] sm:$0xff] %v1781_v18  ;;  %1790 = vpow2.f32 %v1385_v16  ;;  %v1152_v22 = vmul.f32 %v1024_v17, %v896_v11  ;;  %v898_v23 = vsub.f32 %v699_v21, %v2301_v58  ;;  %v694_v24 = vpop.permute.xlu0 %693  ;;  %p1844_p4 = pnand %p1843_p3, %p1837_p0 }
 0x15f   :  { %1792 = vpow2.f32 %v1383_v19  ;;  %v1151_v25 = vmul.f32 %v1023_v20, %v895_v14  ;;  %v897_v26 = vsub.f32 %v694_v24, %v2301_v58 }
 0x160   :  { %v1783_v27 = vpop.eup %1782  ;;  %v1389_v28 = vmul.f32 1.442695, %v1152_v22  ;;  %v1026_v29 = vmul.f32 -322.58, %v898_v23 }
 0x161   :  { %v1785_v30 = vpop.eup %1784  ;;  %1530 = vst [vmem:[#allocation2 + $0x338] sm:$0xff] %v1783_v27  ;;  %v1387_v31 = vmul.f32 1.442695, %v1151_v25  ;;  %v1025_v32 = vmul.f32 -322.58, %v897_v26  ;;  %v709_v33 = vpop.permute.xlu1 %708 }
 0x162   :  { %1529 = vst [vmem:[#allocation2 + $0x330] sm:$0xff] %v1785_v30  ;;  %1794 = vpow2.f32 %v1389_v28  ;;  %v1154_v34 = vmul.f32 %v1026_v29, %v898_v23  ;;  %v900_v35 = vsub.f32 %v709_v33, %v2301_v58  ;;  %v704_v36 = vpop.permute.xlu0 %703 }
 0x163   :  { %1796 = vpow2.f32 %v1387_v31  ;;  %v1153_v37 = vmul.f32 %v1025_v32, %v897_v26  ;;  %v899_v38 = vsub.f32 %v704_v36, %v2301_v58 }
 0x164   :  { %v1787_v39 = vpop.eup %1786  ;;  %v1393_v40 = vmul.f32 1.442695, %v1154_v34  ;;  %v1028_v41 = vmul.f32 -322.58, %v900_v35 }
 0x165   :  { %v1789_v42 = vpop.eup %1788  ;;  %1532 = vst [vmem:[#allocation2 + $0x348] sm:$0xff] %v1787_v39  ;;  %v1391_v43 = vmul.f32 1.442695, %v1153_v37  ;;  %v1027_v44 = vmul.f32 -322.58, %v899_v38  ;;  %v719_v45 = vpop.permute.xlu1 %718 }
 0x166   :  { %1531 = vst [vmem:[#allocation2 + $0x340] sm:$0xff] %v1789_v42  ;;  %1798 = vpow2.f32 %v1393_v40  ;;  %v1156_v46 = vmul.f32 %v1028_v41, %v900_v35  ;;  %v902_v47 = vsub.f32 %v719_v45, %v2301_v58  ;;  %v714_v48 = vpop.permute.xlu0 %713 }
 0x167   :  { %1800 = vpow2.f32 %v1391_v43  ;;  %v1155_v49 = vmul.f32 %v1027_v44, %v899_v38  ;;  %v901_v50 = vsub.f32 %v714_v48, %v2301_v58 }
 0x168   :  { %v1791_v51 = vpop.eup %1790  ;;  %v1397_v52 = vmul.f32 1.442695, %v1156_v46  ;;  %v1030_v53 = vmul.f32 -322.58, %v902_v47 }
 0x169   :  { %v1793_v54 = vpop.eup %1792  ;;  %1534 = vst [vmem:[#allocation2 + $0x358] sm:$0xff] %v1791_v51  ;;  %v1395_v1 = vmul.f32 1.442695, %v1155_v49  ;;  %v1029_v55 = vmul.f32 -322.58, %v901_v50  ;;  %v729_v56 = vpop.permute.xlu1 %728 }
 0x16a   :  { %1533 = vst [vmem:[#allocation2 + $0x350] sm:$0xff] %v1793_v54  ;;  %1802 = vpow2.f32 %v1397_v52  ;;  %v1158_v57 = vmul.f32 %v1030_v53, %v902_v47  ;;  %v904_v60 = vsub.f32 %v729_v56, %v2392_v59  ;;  %v724_v61 = vpop.permute.xlu0 %723 }
 0x16b   :  { %1804 = vpow2.f32 %v1395_v1  ;;  %v1157_v58 = vmul.f32 %v1029_v55, %v901_v50  ;;  %v903_v62 = vsub.f32 %v724_v61, %v2392_v59 }
 0x16c   :  { %v1795_v63 = vpop.eup %1794  ;;  %v1401_v0 = vmul.f32 1.442695, %v1158_v57  ;;  %v1032_v2 = vmul.f32 -322.58, %v904_v60 }
 0x16d   :  { %v1797_v3 = vpop.eup %1796  ;;  %1536 = vst [vmem:[#allocation2 + $0x368] sm:$0xff] %v1795_v63  ;;  %v1399_v4 = vmul.f32 1.442695, %v1157_v58  ;;  %v1031_v5 = vmul.f32 -322.58, %v903_v62  ;;  %v739_v6 = vpop.permute.xlu1 %738 }
 0x16e   :  { %1535 = vst [vmem:[#allocation2 + $0x360] sm:$0xff] %v1797_v3  ;;  %1806 = vpow2.f32 %v1401_v0  ;;  %v1160_v7 = vmul.f32 %v1032_v2, %v904_v60  ;;  %v906_v8 = vsub.f32 %v739_v6, %v2392_v59  ;;  %v734_v9 = vpop.permute.xlu0 %733 }
 0x16f   :  { %1808 = vpow2.f32 %v1399_v4  ;;  %v1159_v10 = vmul.f32 %v1031_v5, %v903_v62  ;;  %v905_v11 = vsub.f32 %v734_v9, %v2392_v59 }
 0x170   :  { %v1799_v12 = vpop.eup %1798  ;;  %v1405_v13 = vmul.f32 1.442695, %v1160_v7  ;;  %v1034_v14 = vmul.f32 -322.58, %v906_v8 }
 0x171   :  { %v1801_v15 = vpop.eup %1800  ;;  %1538 = vst [vmem:[#allocation2 + $0x378] sm:$0xff] %v1799_v12  ;;  %v1403_v16 = vmul.f32 1.442695, %v1159_v10  ;;  %v1033_v17 = vmul.f32 -322.58, %v905_v11  ;;  %v749_v18 = vpop.permute.xlu1 %748 }
 0x172   :  { %1537 = vst [vmem:[#allocation2 + $0x370] sm:$0xff] %v1801_v15  ;;  %1810 = vpow2.f32 %v1405_v13  ;;  %v1162_v19 = vmul.f32 %v1034_v14, %v906_v8  ;;  %v908_v20 = vsub.f32 %v749_v18, %v2392_v59  ;;  %v744_v21 = vpop.permute.xlu0 %743 }
 0x173   :  { %1812 = vpow2.f32 %v1403_v16  ;;  %v1161_v22 = vmul.f32 %v1033_v17, %v905_v11  ;;  %v907_v23 = vsub.f32 %v744_v21, %v2392_v59 }
 0x174   :  { %v1803_v24 = vpop.eup %1802  ;;  %v1409_v25 = vmul.f32 1.442695, %v1162_v19  ;;  %v1036_v26 = vmul.f32 -322.58, %v908_v20 }
 0x175   :  { %v1805_v27 = vpop.eup %1804  ;;  %1540 = vst [vmem:[#allocation2 + $0x388] sm:$0xff] %v1803_v24  ;;  %v1407_v28 = vmul.f32 1.442695, %v1161_v22  ;;  %v1035_v29 = vmul.f32 -322.58, %v907_v23  ;;  %v759_v30 = vpop.permute.xlu1 %758 }
 0x176   :  { %1539 = vst [vmem:[#allocation2 + $0x380] sm:$0xff] %v1805_v27  ;;  %1814 = vpow2.f32 %v1409_v25  ;;  %v1164_v31 = vmul.f32 %v1036_v26, %v908_v20  ;;  %v910_v32 = vsub.f32 %v759_v30, %v2392_v59  ;;  %v754_v33 = vpop.permute.xlu0 %753 }
 0x177   :  { %1816 = vpow2.f32 %v1407_v28  ;;  %v1163_v34 = vmul.f32 %v1035_v29, %v907_v23  ;;  %v909_v35 = vsub.f32 %v754_v33, %v2392_v59 }
 0x178   :  { %v1807_v36 = vpop.eup %1806  ;;  %v1413_v37 = vmul.f32 1.442695, %v1164_v31  ;;  %v1038_v38 = vmul.f32 -322.58, %v910_v32 }
 0x179   :  { %v1809_v39 = vpop.eup %1808  ;;  %1542 = vst [vmem:[#allocation2 + $0x398] sm:$0xff] %v1807_v36  ;;  %v1411_v40 = vmul.f32 1.442695, %v1163_v34  ;;  %v1037_v41 = vmul.f32 -322.58, %v909_v35  ;;  %v769_v42 = vpop.permute.xlu1 %768 }
 0x17a   :  { %1541 = vst [vmem:[#allocation2 + $0x390] sm:$0xff] %v1809_v39  ;;  %1818 = vpow2.f32 %v1413_v37  ;;  %v1166_v43 = vmul.f32 %v1038_v38, %v910_v32  ;;  %v912_v44 = vsub.f32 %v769_v42, %v2392_v59  ;;  %v764_v45 = vpop.permute.xlu0 %763 }
 0x17b   :  { %1820 = vpow2.f32 %v1411_v40  ;;  %v1165_v46 = vmul.f32 %v1037_v41, %v909_v35  ;;  %v911_v47 = vsub.f32 %v764_v45, %v2392_v59 }
 0x17c   :  { %v1811_v48 = vpop.eup %1810  ;;  %v1417_v49 = vmul.f32 1.442695, %v1166_v43  ;;  %v1040_v50 = vmul.f32 -322.58, %v912_v44 }
 0x17d   :  { %v1813_v51 = vpop.eup %1812  ;;  %1544 = vst [vmem:[#allocation2 + $0x3a8] sm:$0xff] %v1811_v48  ;;  %v1415_v52 = vmul.f32 1.442695, %v1165_v46  ;;  %v1039_v53 = vmul.f32 -322.58, %v911_v47  ;;  %v779_v54 = vpop.permute.xlu1 %778 }
 0x17e   :  { %1543 = vst [vmem:[#allocation2 + $0x3a0] sm:$0xff] %v1813_v51  ;;  %1822 = vpow2.f32 %v1417_v49  ;;  %v1168_v1 = vmul.f32 %v1040_v50, %v912_v44  ;;  %v914_v55 = vsub.f32 %v779_v54, %v2392_v59  ;;  %v774_v56 = vpop.permute.xlu0 %773 }
 0x17f   :  { %1824 = vpow2.f32 %v1415_v52  ;;  %v1167_v57 = vmul.f32 %v1039_v53, %v911_v47  ;;  %v913_v60 = vsub.f32 %v774_v56, %v2392_v59 }
 0x180   :  { %v1815_v61 = vpop.eup %1814  ;;  %v1421_v58 = vmul.f32 1.442695, %v1168_v1  ;;  %v1042_v62 = vmul.f32 -322.58, %v914_v55 }
 0x181   :  { %v1817_v63 = vpop.eup %1816  ;;  %1546 = vst [vmem:[#allocation2 + $0x3b8] sm:$0xff] %v1815_v61  ;;  %v1419_v0 = vmul.f32 1.442695, %v1167_v57  ;;  %v1041_v2 = vmul.f32 -322.58, %v913_v60 }
 0x182   :  { %1545 = vst [vmem:[#allocation2 + $0x3b0] sm:$0xff] %v1817_v63  ;;  %1826 = vpow2.f32 %v1421_v58  ;;  %v1170_v3 = vmul.f32 %v1042_v62, %v914_v55 }
 0x183   :  { %1828 = vpow2.f32 %v1419_v0  ;;  %v1169_v4 = vmul.f32 %v1041_v2, %v913_v60 }
 0x184   :  { %v1819_v5 = vpop.eup %1818  ;;  %v1425_v6 = vmul.f32 1.442695, %v1170_v3 }
 0x185   :  { %v1821_v7 = vpop.eup %1820  ;;  %1548 = vst [vmem:[#allocation2 + $0x3c8] sm:$0xff] %v1819_v5  ;;  %v1423_v8 = vmul.f32 1.442695, %v1169_v4 }
 0x186   :  { %1547 = vst [vmem:[#allocation2 + $0x3c0] sm:$0xff] %v1821_v7  ;;  %1830 = vpow2.f32 %v1425_v6 }
 0x187   :  { %1832 = vpow2.f32 %v1423_v8 }
 0x188   :  { %v1823_v59 = vpop.eup %1822 }
 0x189   :  { %v1825_v9 = vpop.eup %1824  ;;  %1550 = vst [vmem:[#allocation2 + $0x3d8] sm:$0xff] %v1823_v59 }
 0x18a   :  { %1549 = vst [vmem:[#allocation2 + $0x3d0] sm:$0xff] %v1825_v9 }
 0x18c   :  { %v1827_v10 = vpop.eup %1826 }
 0x18d   :  { %v1829_v11 = vpop.eup %1828  ;;  %1552 = vst [vmem:[#allocation2 + $0x3e8] sm:$0xff] %v1827_v10 }
 0x18e   :  { %1551 = vst [vmem:[#allocation2 + $0x3e0] sm:$0xff] %v1829_v11 }
 0x190   :  { %v1831_v12 = vpop.eup %1830 }
 0x191   :  { %v1833_v13 = vpop.eup %1832  ;;  %1554 = vst [vmem:[#allocation2 + $0x3f8] sm:$0xff] %v1831_v12 }
 0x192   :  { %1553 = vst [vmem:[#allocation2 + $0x3f0] sm:$0xff] %v1833_v13 }
 0x193   :  { %1847 = shalt.err (!%p1844_p4)
}
 0x194   :  { %s1848_s22 = scalar_lea.hbm %s2420_s2, 16384 }
 0x195   :  { %p1849_p5 = scmp.ne.s32.totalorder %s2420_s2, %s1848_s22  ;;  %p1852_p6 = scmp.lt.u32.totalorder %s1848_s22, %s2420_s2 }
 0x197   :  { %p1854_p7 = pnand %p1852_p6, %p1849_p5 }
 0x199   :  { %1857 = shalt.err (!%p1854_p7)
}
 0x19a   :  { %s1862_s27 = smov 128   ;;  %s1863_s28 = smov 8  }
 0x19b   :  { %1566 = dma.vmem_to_hbm [thread:$0]  %s1561_s18, 16384, %s2420_s2, [#allocation3], %s1862_s27, %s1862_s27, %s1863_s28  }
 0x19c   :  { %1858 = dma.done.wait [#allocation3], 16384  }
 0x19d   :  { %1859 = vsyncadd [#allocation3], 4294950912 }
 0x19e   :  { %1570 = vsyncpa [#allocation3], 1 }

</bundles_post_ra>
